<compile_context>
chip_gen: v6e
topology: v6e:2x2x1
jax: 0.10.0
libtpu: 0.0.40
codegen_flags: <defaults>
</compile_context>

<pallas_src>
import jax
import jax.numpy as jnp
from jax.experimental import pallas as pl
from jax.experimental.pallas import tpu as pltpu


def make_lstm_kernel(num_layers, T, B, H):
    """Stacked-LSTM recurrence (wavefront over layers) + fc on last timestep.

    Ref order (matches the wrapper's `args`):
      xg0      : (T*B, 4H) f32   layer-0 input projection, bias folded in
      w_hh_0   : (H, 4H)  bf16
      for l in 1..L-1:
        w_ih_l : (H, 4H)  bf16
        b_l    : (1, 4H)  f32    (b_ih + b_hh)
        w_hh_l : (H, 4H)  bf16
      w_fc     : (H, O_pad) bf16
      b_fc     : (1, O_pad) f32
      out_ref  : (B, O_pad) f32
    """

    def kernel(*refs):
        idx = 0
        xg0_ref = refs[idx]; idx += 1
        w_hh_refs = [None] * num_layers
        w_ih_refs = [None] * num_layers
        b_refs = [None] * num_layers
        w_hh_refs[0] = refs[idx]; idx += 1
        for l in range(1, num_layers):
            w_ih_refs[l] = refs[idx]; idx += 1
            b_refs[l] = refs[idx]; idx += 1
            w_hh_refs[l] = refs[idx]; idx += 1
        w_fc_ref = refs[idx]; idx += 1
        b_fc_ref = refs[idx]; idx += 1
        out_ref = refs[idx]

        f32 = jnp.float32
        bf16 = jnp.bfloat16

        # Hoist weight loads and the per-layer bias broadcast out of the
        # recurrence (each w_* is only a couple of vregs in bf16).
        w_hh = [w_hh_refs[l][...] for l in range(num_layers)]
        w_ih = [w_ih_refs[l][...] if l > 0 else None for l in range(num_layers)]
        b_in = [jnp.broadcast_to(b_refs[l][...], (B, 4 * H)) if l > 0 else None
                for l in range(num_layers)]

        h = [jnp.zeros((B, H), f32) for _ in range(num_layers)]
        c = [jnp.zeros((B, H), f32) for _ in range(num_layers)]
        h_bf = [jnp.zeros((B, H), bf16) for _ in range(num_layers)]

        # Fully unrolled wavefront: within step t, layer l consumes layer
        # l-1's freshly computed h (correct nn.LSTM semantics); across steps
        # the layers form independent chains the scheduler can overlap.
        # All ops are row-wise, so the zero-padded batch rows stay inert.
        for t in range(T):
            for l in range(num_layers):
                if l == 0:
                    # Precomputed slab; static, sublane-aligned row slice.
                    xpart = xg0_ref[pl.ds(t * B, B), :]
                else:
                    xpart = jnp.dot(h_bf[l - 1], w_ih[l],
                                    preferred_element_type=f32) + b_in[l]
                gates = xpart + jnp.dot(h_bf[l], w_hh[l],
                                        preferred_element_type=f32)  # (B, 4H)
                sig = jax.nn.sigmoid(gates)       # full-vreg EUP op (f32)
                th = jnp.tanh(gates)              # full-vreg EUP op (f32)
                i_g = sig[:, 0 * H:1 * H]
                f_g = sig[:, 1 * H:2 * H]
                g_g = th[:, 2 * H:3 * H]
                o_g = sig[:, 3 * H:4 * H]
                c[l] = f_g * c[l] + i_g * g_g
                h[l] = o_g * jnp.tanh(c[l])
                h_bf[l] = h[l].astype(bf16)       # single cast per layer/step

        # Final fc on the top layer's last hidden state (bf16 MXU, f32 acc).
        out_ref[...] = (
            jnp.dot(h_bf[num_layers - 1], w_fc_ref[...],
                    preferred_element_type=f32) + b_fc_ref[...]
        )

    return kernel


def prepare_params(params, hidden_size, num_layers, output_size):
    """One-time weight prep: transpose, pad, cast. Hoisted out of the forward."""
    O_pad = ((output_size + 127) // 128) * 128
    prep = {}
    # Layer 0: its input projection is done in the (jitted) wrapper, so keep
    # the transposed weight / bias in f32 for the XLA matmul there.
    prep["w_ih0_t"] = jnp.transpose(params["w_ih_0"]).astype(jnp.float32)  # (I,4H)
    prep["b_0"] = params["b_0"].astype(jnp.float32)                        # (1,4H)
    for l in range(1, num_layers):
        prep[f"w_ih_{l}_t"] = jnp.transpose(
            params[f"w_ih_{l}"]).astype(jnp.bfloat16)                      # (H,4H)
        prep[f"b_{l}"] = params[f"b_{l}"].astype(jnp.float32)              # (1,4H)
    for l in range(num_layers):
        prep[f"w_hh_{l}_t"] = jnp.transpose(
            params[f"w_hh_{l}"]).astype(jnp.bfloat16)                      # (H,4H)
    w_fc_t = jnp.transpose(params["w_fc"])                                 # (H,O)
    prep["w_fc_t"] = jnp.pad(
        w_fc_t, ((0, 0), (0, O_pad - output_size))).astype(jnp.bfloat16)
    prep["b_fc"] = jnp.pad(
        params["b_fc"], ((0, 0), (0, O_pad - output_size))).astype(jnp.float32)
    return prep


def lstm_model_forward(x, prep, hidden_size, num_layers, output_size):
    """x: (batch, seq, input_size) -> (batch, output_size)."""
    B, T, I = x.shape
    H = hidden_size
    B_pad = ((B + 7) // 8) * 8              # sublane multiple
    O_pad = prep["b_fc"].shape[1]           # lane-dense output slab

    # Time-major, batch zero-padded (rows sliced off at the end).
    x_tm = jnp.transpose(x, (1, 0, 2)).astype(jnp.float32)      # (T, B, I)
    x_tm = jnp.pad(x_tm, ((0, 0), (0, B_pad - B), (0, 0)))
    x_flat = x_tm.reshape(T * B_pad, I)

    # Layer-0 input projection as a plain XLA matmul (K=I is tiny; keeps the
    # nearly-empty x slab and a wasted MXU pass out of the kernel).
    xg0 = x_flat @ prep["w_ih0_t"] + prep["b_0"]                # (T*B_pad, 4H) f32

    args = [xg0, prep["w_hh_0_t"]]
    for l in range(1, num_layers):
        args += [prep[f"w_ih_{l}_t"], prep[f"b_{l}"], prep[f"w_hh_{l}_t"]]
    args += [prep["w_fc_t"], prep["b_fc"]]

    vmem = lambda: pl.BlockSpec(memory_space=pltpu.MemorySpace.VMEM)
    kernel = make_lstm_kernel(num_layers, T, B_pad, H)

    out = pl.pallas_call(
        kernel,
        out_shape=jax.ShapeDtypeStruct((B_pad, O_pad), jnp.float32),
        in_specs=[vmem() for _ in args],
        out_specs=vmem(),
        # No vmem_limit override: footprint < 1 MiB, defaults are
        # generation-safe (v5e/v6e/v7x).
    )(*args)
    return out[:B, :output_size]


def lstm_reference(x, params, hidden_size, num_layers):
    """Pure-JAX f32 reference matching torch.nn.LSTM(batch_first=True)+Linear."""
    B, T, _ = x.shape
    H = hidden_size
    layer_in = x.astype(jnp.float32)
    h = None
    for l in range(num_layers):
        w_ih = params[f"w_ih_{l}"]
        w_hh = params[f"w_hh_{l}"]
        b = params[f"b_{l}"][0]
        h = jnp.zeros((B, H), jnp.float32)
        c = jnp.zeros((B, H), jnp.float32)
        ys = []
        for t in range(T):
            gates = layer_in[:, t, :] @ w_ih.T + h @ w_hh.T + b
            i_g = jax.nn.sigmoid(gates[:, 0 * H:1 * H])
            f_g = jax.nn.sigmoid(gates[:, 1 * H:2 * H])
            g_g = jnp.tanh(gates[:, 2 * H:3 * H])
            o_g = jax.nn.sigmoid(gates[:, 3 * H:4 * H])
            c = f_g * c + i_g * g_g
            h = o_g * jnp.tanh(c)
            ys.append(h)
        layer_in = jnp.stack(ys, axis=1)
    return h @ params["w_fc"].T + params["b_fc"]


def init_params(key, input_size, hidden_size, num_layers, output_size):
    """Deterministic PyTorch-style uniform(-1/sqrt(H), 1/sqrt(H)) init."""
    params = {}
    k = 1.0 / jnp.sqrt(jnp.float32(hidden_size))
    for l in range(num_layers):
        d_in = input_size if l == 0 else hidden_size
        key, k1, k2, k3, k4 = jax.random.split(key, 5)
        params[f"w_ih_{l}"] = jax.random.uniform(
            k1, (4 * hidden_size, d_in), jnp.float32, -k, k)
        params[f"w_hh_{l}"] = jax.random.uniform(
            k2, (4 * hidden_size, hidden_size), jnp.float32, -k, k)
        b_ih = jax.random.uniform(k3, (4 * hidden_size,), jnp.float32, -k, k)
        b_hh = jax.random.uniform(k4, (4 * hidden_size,), jnp.float32, -k, k)
        params[f"b_{l}"] = (b_ih + b_hh)[None, :]   # combined bias, (1, 4H)
    key, k5, k6 = jax.random.split(key, 3)
    params["w_fc"] = jax.random.uniform(
        k5, (output_size, hidden_size), jnp.float32, -k, k)
    params["b_fc"] = jax.random.uniform(
        k6, (1, output_size), jnp.float32, -k, k)
    return params


if __name__ == "__main__":
    BATCH = 2
    SEQ = 8
    INPUT_SIZE = 4
    HIDDEN_SIZE = 32
    NUM_LAYERS = 2
    OUTPUT_SIZE = 1

    key = jax.random.PRNGKey(0)
    key_x, key_p = jax.random.split(key)
    x = jax.random.normal(key_x, (BATCH, SEQ, INPUT_SIZE), jnp.float32)
    params = init_params(key_p, INPUT_SIZE, HIDDEN_SIZE, NUM_LAYERS, OUTPUT_SIZE)

    # One-time weight prep (transposes/pads/bf16 casts hoisted out of the
    # per-call path), then a jitted forward so input prep fuses with the call.
    prep = prepare_params(params, HIDDEN_SIZE, NUM_LAYERS, OUTPUT_SIZE)
    fwd = jax.jit(lstm_model_forward,
                  static_argnames=("hidden_size", "num_layers", "output_size"))

    out = fwd(x, prep, hidden_size=HIDDEN_SIZE, num_layers=NUM_LAYERS,
              output_size=OUTPUT_SIZE)
    out = jax.block_until_ready(out)

    ref = lstm_reference(x, params, HIDDEN_SIZE, NUM_LAYERS)
    assert out.shape == (BATCH, OUTPUT_SIZE), out.shape
    # bf16 MXU operands (deliberate, per perf review) -> looser tolerance
    # than the pure-f32 reference.
    assert jnp.allclose(out, ref, atol=2e-2, rtol=2e-2), (out, ref)

    print("KERNEL_OK")
</pallas_src>

<mosaic_0001>
module attributes {stable_mosaic.version = 11 : i64} {
  func.func @kernel(%arg0: memref<64x128xf32, #tpu.memory_space<vmem>>, %arg1: memref<32x128xbf16, #tpu.memory_space<vmem>>, %arg2: memref<32x128xbf16, #tpu.memory_space<vmem>>, %arg3: memref<1x128xf32, #tpu.memory_space<vmem>>, %arg4: memref<32x128xbf16, #tpu.memory_space<vmem>>, %arg5: memref<32x128xbf16, #tpu.memory_space<vmem>>, %arg6: memref<1x128xf32, #tpu.memory_space<vmem>>, %arg7: memref<8x128xf32, #tpu.memory_space<vmem>>) attributes {dimension_semantics = [], scalar_prefetch = 0 : i64, scratch_operands = 0 : i64, tpu.core_type = #tpu.core_type<tc>} {
    %c0 = arith.constant 0 : index
    %c0_0 = arith.constant 0 : index
    %0 = vector.load %arg1[%c0, %c0_0] : memref<32x128xbf16, #tpu.memory_space<vmem>>, vector<32x128xbf16>
    %c0_1 = arith.constant 0 : index
    %c0_2 = arith.constant 0 : index
    %1 = vector.load %arg4[%c0_1, %c0_2] : memref<32x128xbf16, #tpu.memory_space<vmem>>, vector<32x128xbf16>
    %c0_3 = arith.constant 0 : index
    %c0_4 = arith.constant 0 : index
    %2 = vector.load %arg2[%c0_3, %c0_4] : memref<32x128xbf16, #tpu.memory_space<vmem>>, vector<32x128xbf16>
    %c0_5 = arith.constant 0 : index
    %c0_6 = arith.constant 0 : index
    %3 = vector.load %arg3[%c0_5, %c0_6] : memref<1x128xf32, #tpu.memory_space<vmem>>, vector<1x128xf32>
    %4 = vector.shape_cast %3 : vector<1x128xf32> to vector<1x128xf32>
    %5 = vector.broadcast %4 : vector<1x128xf32> to vector<8x128xf32>
    %cst = arith.constant 0.000000e+00 : f32
    %6 = vector.broadcast %cst : f32 to vector<8x32xf32>
    %cst_7 = arith.constant 0.000000e+00 : f32
    %7 = vector.broadcast %cst_7 : f32 to vector<8x32xf32>
    %cst_8 = arith.constant 0.000000e+00 : bf16
    %8 = vector.broadcast %cst_8 : bf16 to vector<8x32xbf16>
    %cst_9 = arith.constant 0.000000e+00 : bf16
    %9 = vector.broadcast %cst_9 : bf16 to vector<8x32xbf16>
    %c0_10 = arith.constant 0 : index
    %c0_11 = arith.constant 0 : index
    %10 = vector.load %arg0[%c0_10, %c0_11] : memref<64x128xf32, #tpu.memory_space<vmem>>, vector<8x128xf32>
    %cst_12 = arith.constant dense<0.000000e+00> : vector<8x128xf32>
    %11 = tpu.matmul %8, %0, %cst_12 {dimension_numbers = #tpu.dot_dimension_numbers<[1], [0], [0], [1], [0, 0, 1, 1], [], []>} : vector<8x32xbf16>, vector<32x128xbf16>, vector<8x128xf32> -> vector<8x128xf32>
    %12 = arith.addf %10, %11 : vector<8x128xf32>
    %13 = arith.negf %12 : vector<8x128xf32>
    %14 = math.exp %13 : vector<8x128xf32>
    %cst_13 = arith.constant 1.000000e+00 : f32
    %15 = vector.broadcast %cst_13 : f32 to vector<8x128xf32>
    %16 = arith.addf %15, %14 : vector<8x128xf32>
    %17 = arith.divf %15, %16 : vector<8x128xf32>
    %18 = math.tanh %12 : vector<8x128xf32>
    %19 = vector.extract_strided_slice %17 {offsets = [0, 0], sizes = [8, 32], strides = [1, 1]} : vector<8x128xf32> to vector<8x32xf32>
    %20 = vector.extract_strided_slice %17 {offsets = [0, 32], sizes = [8, 32], strides = [1, 1]} : vector<8x128xf32> to vector<8x32xf32>
    %21 = vector.extract_strided_slice %18 {offsets = [0, 64], sizes = [8, 32], strides = [1, 1]} : vector<8x128xf32> to vector<8x32xf32>
    %22 = vector.extract_strided_slice %17 {offsets = [0, 96], sizes = [8, 32], strides = [1, 1]} : vector<8x128xf32> to vector<8x32xf32>
    %23 = arith.mulf %20, %6 : vector<8x32xf32>
    %24 = arith.mulf %19, %21 : vector<8x32xf32>
    %25 = arith.addf %23, %24 : vector<8x32xf32>
    %26 = math.tanh %25 : vector<8x32xf32>
    %27 = arith.mulf %22, %26 : vector<8x32xf32>
    %28 = arith.truncf %27 : vector<8x32xf32> to vector<8x32xbf16>
    %cst_14 = arith.constant dense<0.000000e+00> : vector<8x128xf32>
    %29 = tpu.matmul %28, %2, %cst_14 {dimension_numbers = #tpu.dot_dimension_numbers<[1], [0], [0], [1], [0, 0, 1, 1], [], []>} : vector<8x32xbf16>, vector<32x128xbf16>, vector<8x128xf32> -> vector<8x128xf32>
    %30 = arith.addf %29, %5 : vector<8x128xf32>
    %cst_15 = arith.constant dense<0.000000e+00> : vector<8x128xf32>
    %31 = tpu.matmul %9, %1, %cst_15 {dimension_numbers = #tpu.dot_dimension_numbers<[1], [0], [0], [1], [0, 0, 1, 1], [], []>} : vector<8x32xbf16>, vector<32x128xbf16>, vector<8x128xf32> -> vector<8x128xf32>
    %32 = arith.addf %30, %31 : vector<8x128xf32>
    %33 = arith.negf %32 : vector<8x128xf32>
    %34 = math.exp %33 : vector<8x128xf32>
    %cst_16 = arith.constant 1.000000e+00 : f32
    %35 = vector.broadcast %cst_16 : f32 to vector<8x128xf32>
    %36 = arith.addf %35, %34 : vector<8x128xf32>
    %37 = arith.divf %35, %36 : vector<8x128xf32>
    %38 = math.tanh %32 : vector<8x128xf32>
    %39 = vector.extract_strided_slice %37 {offsets = [0, 0], sizes = [8, 32], strides = [1, 1]} : vector<8x128xf32> to vector<8x32xf32>
    %40 = vector.extract_strided_slice %37 {offsets = [0, 32], sizes = [8, 32], strides = [1, 1]} : vector<8x128xf32> to vector<8x32xf32>
    %41 = vector.extract_strided_slice %38 {offsets = [0, 64], sizes = [8, 32], strides = [1, 1]} : vector<8x128xf32> to vector<8x32xf32>
    %42 = vector.extract_strided_slice %37 {offsets = [0, 96], sizes = [8, 32], strides = [1, 1]} : vector<8x128xf32> to vector<8x32xf32>
    %43 = arith.mulf %40, %7 : vector<8x32xf32>
    %44 = arith.mulf %39, %41 : vector<8x32xf32>
    %45 = arith.addf %43, %44 : vector<8x32xf32>
    %46 = math.tanh %45 : vector<8x32xf32>
    %47 = arith.mulf %42, %46 : vector<8x32xf32>
    %48 = arith.truncf %47 : vector<8x32xf32> to vector<8x32xbf16>
    %c8 = arith.constant 8 : index
    %c0_17 = arith.constant 0 : index
    %49 = vector.load %arg0[%c8, %c0_17] : memref<64x128xf32, #tpu.memory_space<vmem>>, vector<8x128xf32>
    %cst_18 = arith.constant dense<0.000000e+00> : vector<8x128xf32>
    %50 = tpu.matmul %28, %0, %cst_18 {dimension_numbers = #tpu.dot_dimension_numbers<[1], [0], [0], [1], [0, 0, 1, 1], [], []>} : vector<8x32xbf16>, vector<32x128xbf16>, vector<8x128xf32> -> vector<8x128xf32>
    %51 = arith.addf %49, %50 : vector<8x128xf32>
    %52 = arith.negf %51 : vector<8x128xf32>
    %53 = math.exp %52 : vector<8x128xf32>
    %cst_19 = arith.constant 1.000000e+00 : f32
    %54 = vector.broadcast %cst_19 : f32 to vector<8x128xf32>
    %55 = arith.addf %54, %53 : vector<8x128xf32>
    %56 = arith.divf %54, %55 : vector<8x128xf32>
    %57 = math.tanh %51 : vector<8x128xf32>
    %58 = vector.extract_strided_slice %56 {offsets = [0, 0], sizes = [8, 32], strides = [1, 1]} : vector<8x128xf32> to vector<8x32xf32>
    %59 = vector.extract_strided_slice %56 {offsets = [0, 32], sizes = [8, 32], strides = [1, 1]} : vector<8x128xf32> to vector<8x32xf32>
    %60 = vector.extract_strided_slice %57 {offsets = [0, 64], sizes = [8, 32], strides = [1, 1]} : vector<8x128xf32> to vector<8x32xf32>
    %61 = vector.extract_strided_slice %56 {offsets = [0, 96], sizes = [8, 32], strides = [1, 1]} : vector<8x128xf32> to vector<8x32xf32>
    %62 = arith.mulf %59, %25 : vector<8x32xf32>
    %63 = arith.mulf %58, %60 : vector<8x32xf32>
    %64 = arith.addf %62, %63 : vector<8x32xf32>
    %65 = math.tanh %64 : vector<8x32xf32>
    %66 = arith.mulf %61, %65 : vector<8x32xf32>
    %67 = arith.truncf %66 : vector<8x32xf32> to vector<8x32xbf16>
    %cst_20 = arith.constant dense<0.000000e+00> : vector<8x128xf32>
    %68 = tpu.matmul %67, %2, %cst_20 {dimension_numbers = #tpu.dot_dimension_numbers<[1], [0], [0], [1], [0, 0, 1, 1], [], []>} : vector<8x32xbf16>, vector<32x128xbf16>, vector<8x128xf32> -> vector<8x128xf32>
    %69 = arith.addf %68, %5 : vector<8x128xf32>
    %cst_21 = arith.constant dense<0.000000e+00> : vector<8x128xf32>
    %70 = tpu.matmul %48, %1, %cst_21 {dimension_numbers = #tpu.dot_dimension_numbers<[1], [0], [0], [1], [0, 0, 1, 1], [], []>} : vector<8x32xbf16>, vector<32x128xbf16>, vector<8x128xf32> -> vector<8x128xf32>
    %71 = arith.addf %69, %70 : vector<8x128xf32>
    %72 = arith.negf %71 : vector<8x128xf32>
    %73 = math.exp %72 : vector<8x128xf32>
    %cst_22 = arith.constant 1.000000e+00 : f32
    %74 = vector.broadcast %cst_22 : f32 to vector<8x128xf32>
    %75 = arith.addf %74, %73 : vector<8x128xf32>
    %76 = arith.divf %74, %75 : vector<8x128xf32>
    %77 = math.tanh %71 : vector<8x128xf32>
    %78 = vector.extract_strided_slice %76 {offsets = [0, 0], sizes = [8, 32], strides = [1, 1]} : vector<8x128xf32> to vector<8x32xf32>
    %79 = vector.extract_strided_slice %76 {offsets = [0, 32], sizes = [8, 32], strides = [1, 1]} : vector<8x128xf32> to vector<8x32xf32>
    %80 = vector.extract_strided_slice %77 {offsets = [0, 64], sizes = [8, 32], strides = [1, 1]} : vector<8x128xf32> to vector<8x32xf32>
    %81 = vector.extract_strided_slice %76 {offsets = [0, 96], sizes = [8, 32], strides = [1, 1]} : vector<8x128xf32> to vector<8x32xf32>
    %82 = arith.mulf %79, %45 : vector<8x32xf32>
    %83 = arith.mulf %78, %80 : vector<8x32xf32>
    %84 = arith.addf %82, %83 : vector<8x32xf32>
    %85 = math.tanh %84 : vector<8x32xf32>
    %86 = arith.mulf %81, %85 : vector<8x32xf32>
    %87 = arith.truncf %86 : vector<8x32xf32> to vector<8x32xbf16>
    %c16 = arith.constant 16 : index
    %c0_23 = arith.constant 0 : index
    %88 = vector.load %arg0[%c16, %c0_23] : memref<64x128xf32, #tpu.memory_space<vmem>>, vector<8x128xf32>
    %cst_24 = arith.constant dense<0.000000e+00> : vector<8x128xf32>
    %89 = tpu.matmul %67, %0, %cst_24 {dimension_numbers = #tpu.dot_dimension_numbers<[1], [0], [0], [1], [0, 0, 1, 1], [], []>} : vector<8x32xbf16>, vector<32x128xbf16>, vector<8x128xf32> -> vector<8x128xf32>
    %90 = arith.addf %88, %89 : vector<8x128xf32>
    %91 = arith.negf %90 : vector<8x128xf32>
    %92 = math.exp %91 : vector<8x128xf32>
    %cst_25 = arith.constant 1.000000e+00 : f32
    %93 = vector.broadcast %cst_25 : f32 to vector<8x128xf32>
    %94 = arith.addf %93, %92 : vector<8x128xf32>
    %95 = arith.divf %93, %94 : vector<8x128xf32>
    %96 = math.tanh %90 : vector<8x128xf32>
    %97 = vector.extract_strided_slice %95 {offsets = [0, 0], sizes = [8, 32], strides = [1, 1]} : vector<8x128xf32> to vector<8x32xf32>
    %98 = vector.extract_strided_slice %95 {offsets = [0, 32], sizes = [8, 32], strides = [1, 1]} : vector<8x128xf32> to vector<8x32xf32>
    %99 = vector.extract_strided_slice %96 {offsets = [0, 64], sizes = [8, 32], strides = [1, 1]} : vector<8x128xf32> to vector<8x32xf32>
    %100 = vector.extract_strided_slice %95 {offsets = [0, 96], sizes = [8, 32], strides = [1, 1]} : vector<8x128xf32> to vector<8x32xf32>
    %101 = arith.mulf %98, %64 : vector<8x32xf32>
    %102 = arith.mulf %97, %99 : vector<8x32xf32>
    %103 = arith.addf %101, %102 : vector<8x32xf32>
    %104 = math.tanh %103 : vector<8x32xf32>
    %105 = arith.mulf %100, %104 : vector<8x32xf32>
    %106 = arith.truncf %105 : vector<8x32xf32> to vector<8x32xbf16>
    %cst_26 = arith.constant dense<0.000000e+00> : vector<8x128xf32>
    %107 = tpu.matmul %106, %2, %cst_26 {dimension_numbers = #tpu.dot_dimension_numbers<[1], [0], [0], [1], [0, 0, 1, 1], [], []>} : vector<8x32xbf16>, vector<32x128xbf16>, vector<8x128xf32> -> vector<8x128xf32>
    %108 = arith.addf %107, %5 : vector<8x128xf32>
    %cst_27 = arith.constant dense<0.000000e+00> : vector<8x128xf32>
    %109 = tpu.matmul %87, %1, %cst_27 {dimension_numbers = #tpu.dot_dimension_numbers<[1], [0], [0], [1], [0, 0, 1, 1], [], []>} : vector<8x32xbf16>, vector<32x128xbf16>, vector<8x128xf32> -> vector<8x128xf32>
    %110 = arith.addf %108, %109 : vector<8x128xf32>
    %111 = arith.negf %110 : vector<8x128xf32>
    %112 = math.exp %111 : vector<8x128xf32>
    %cst_28 = arith.constant 1.000000e+00 : f32
    %113 = vector.broadcast %cst_28 : f32 to vector<8x128xf32>
    %114 = arith.addf %113, %112 : vector<8x128xf32>
    %115 = arith.divf %113, %114 : vector<8x128xf32>
    %116 = math.tanh %110 : vector<8x128xf32>
    %117 = vector.extract_strided_slice %115 {offsets = [0, 0], sizes = [8, 32], strides = [1, 1]} : vector<8x128xf32> to vector<8x32xf32>
    %118 = vector.extract_strided_slice %115 {offsets = [0, 32], sizes = [8, 32], strides = [1, 1]} : vector<8x128xf32> to vector<8x32xf32>
    %119 = vector.extract_strided_slice %116 {offsets = [0, 64], sizes = [8, 32], strides = [1, 1]} : vector<8x128xf32> to vector<8x32xf32>
    %120 = vector.extract_strided_slice %115 {offsets = [0, 96], sizes = [8, 32], strides = [1, 1]} : vector<8x128xf32> to vector<8x32xf32>
    %121 = arith.mulf %118, %84 : vector<8x32xf32>
    %122 = arith.mulf %117, %119 : vector<8x32xf32>
    %123 = arith.addf %121, %122 : vector<8x32xf32>
    %124 = math.tanh %123 : vector<8x32xf32>
    %125 = arith.mulf %120, %124 : vector<8x32xf32>
    %126 = arith.truncf %125 : vector<8x32xf32> to vector<8x32xbf16>
    %c24 = arith.constant 24 : index
    %c0_29 = arith.constant 0 : index
    %127 = vector.load %arg0[%c24, %c0_29] : memref<64x128xf32, #tpu.memory_space<vmem>>, vector<8x128xf32>
    %cst_30 = arith.constant dense<0.000000e+00> : vector<8x128xf32>
    %128 = tpu.matmul %106, %0, %cst_30 {dimension_numbers = #tpu.dot_dimension_numbers<[1], [0], [0], [1], [0, 0, 1, 1], [], []>} : vector<8x32xbf16>, vector<32x128xbf16>, vector<8x128xf32> -> vector<8x128xf32>
    %129 = arith.addf %127, %128 : vector<8x128xf32>
    %130 = arith.negf %129 : vector<8x128xf32>
    %131 = math.exp %130 : vector<8x128xf32>
    %cst_31 = arith.constant 1.000000e+00 : f32
    %132 = vector.broadcast %cst_31 : f32 to vector<8x128xf32>
    %133 = arith.addf %132, %131 : vector<8x128xf32>
    %134 = arith.divf %132, %133 : vector<8x128xf32>
    %135 = math.tanh %129 : vector<8x128xf32>
    %136 = vector.extract_strided_slice %134 {offsets = [0, 0], sizes = [8, 32], strides = [1, 1]} : vector<8x128xf32> to vector<8x32xf32>
    %137 = vector.extract_strided_slice %134 {offsets = [0, 32], sizes = [8, 32], strides = [1, 1]} : vector<8x128xf32> to vector<8x32xf32>
    %138 = vector.extract_strided_slice %135 {offsets = [0, 64], sizes = [8, 32], strides = [1, 1]} : vector<8x128xf32> to vector<8x32xf32>
    %139 = vector.extract_strided_slice %134 {offsets = [0, 96], sizes = [8, 32], strides = [1, 1]} : vector<8x128xf32> to vector<8x32xf32>
    %140 = arith.mulf %137, %103 : vector<8x32xf32>
    %141 = arith.mulf %136, %138 : vector<8x32xf32>
    %142 = arith.addf %140, %141 : vector<8x32xf32>
    %143 = math.tanh %142 : vector<8x32xf32>
    %144 = arith.mulf %139, %143 : vector<8x32xf32>
    %145 = arith.truncf %144 : vector<8x32xf32> to vector<8x32xbf16>
    %cst_32 = arith.constant dense<0.000000e+00> : vector<8x128xf32>
    %146 = tpu.matmul %145, %2, %cst_32 {dimension_numbers = #tpu.dot_dimension_numbers<[1], [0], [0], [1], [0, 0, 1, 1], [], []>} : vector<8x32xbf16>, vector<32x128xbf16>, vector<8x128xf32> -> vector<8x128xf32>
    %147 = arith.addf %146, %5 : vector<8x128xf32>
    %cst_33 = arith.constant dense<0.000000e+00> : vector<8x128xf32>
    %148 = tpu.matmul %126, %1, %cst_33 {dimension_numbers = #tpu.dot_dimension_numbers<[1], [0], [0], [1], [0, 0, 1, 1], [], []>} : vector<8x32xbf16>, vector<32x128xbf16>, vector<8x128xf32> -> vector<8x128xf32>
    %149 = arith.addf %147, %148 : vector<8x128xf32>
    %150 = arith.negf %149 : vector<8x128xf32>
    %151 = math.exp %150 : vector<8x128xf32>
    %cst_34 = arith.constant 1.000000e+00 : f32
    %152 = vector.broadcast %cst_34 : f32 to vector<8x128xf32>
    %153 = arith.addf %152, %151 : vector<8x128xf32>
    %154 = arith.divf %152, %153 : vector<8x128xf32>
    %155 = math.tanh %149 : vector<8x128xf32>
    %156 = vector.extract_strided_slice %154 {offsets = [0, 0], sizes = [8, 32], strides = [1, 1]} : vector<8x128xf32> to vector<8x32xf32>
    %157 = vector.extract_strided_slice %154 {offsets = [0, 32], sizes = [8, 32], strides = [1, 1]} : vector<8x128xf32> to vector<8x32xf32>
    %158 = vector.extract_strided_slice %155 {offsets = [0, 64], sizes = [8, 32], strides = [1, 1]} : vector<8x128xf32> to vector<8x32xf32>
    %159 = vector.extract_strided_slice %154 {offsets = [0, 96], sizes = [8, 32], strides = [1, 1]} : vector<8x128xf32> to vector<8x32xf32>
    %160 = arith.mulf %157, %123 : vector<8x32xf32>
    %161 = arith.mulf %156, %158 : vector<8x32xf32>
    %162 = arith.addf %160, %161 : vector<8x32xf32>
    %163 = math.tanh %162 : vector<8x32xf32>
    %164 = arith.mulf %159, %163 : vector<8x32xf32>
    %165 = arith.truncf %164 : vector<8x32xf32> to vector<8x32xbf16>
    %c32 = arith.constant 32 : index
    %c0_35 = arith.constant 0 : index
    %166 = vector.load %arg0[%c32, %c0_35] : memref<64x128xf32, #tpu.memory_space<vmem>>, vector<8x128xf32>
    %cst_36 = arith.constant dense<0.000000e+00> : vector<8x128xf32>
    %167 = tpu.matmul %145, %0, %cst_36 {dimension_numbers = #tpu.dot_dimension_numbers<[1], [0], [0], [1], [0, 0, 1, 1], [], []>} : vector<8x32xbf16>, vector<32x128xbf16>, vector<8x128xf32> -> vector<8x128xf32>
    %168 = arith.addf %166, %167 : vector<8x128xf32>
    %169 = arith.negf %168 : vector<8x128xf32>
    %170 = math.exp %169 : vector<8x128xf32>
    %cst_37 = arith.constant 1.000000e+00 : f32
    %171 = vector.broadcast %cst_37 : f32 to vector<8x128xf32>
    %172 = arith.addf %171, %170 : vector<8x128xf32>
    %173 = arith.divf %171, %172 : vector<8x128xf32>
    %174 = math.tanh %168 : vector<8x128xf32>
    %175 = vector.extract_strided_slice %173 {offsets = [0, 0], sizes = [8, 32], strides = [1, 1]} : vector<8x128xf32> to vector<8x32xf32>
    %176 = vector.extract_strided_slice %173 {offsets = [0, 32], sizes = [8, 32], strides = [1, 1]} : vector<8x128xf32> to vector<8x32xf32>
    %177 = vector.extract_strided_slice %174 {offsets = [0, 64], sizes = [8, 32], strides = [1, 1]} : vector<8x128xf32> to vector<8x32xf32>
    %178 = vector.extract_strided_slice %173 {offsets = [0, 96], sizes = [8, 32], strides = [1, 1]} : vector<8x128xf32> to vector<8x32xf32>
    %179 = arith.mulf %176, %142 : vector<8x32xf32>
    %180 = arith.mulf %175, %177 : vector<8x32xf32>
    %181 = arith.addf %179, %180 : vector<8x32xf32>
    %182 = math.tanh %181 : vector<8x32xf32>
    %183 = arith.mulf %178, %182 : vector<8x32xf32>
    %184 = arith.truncf %183 : vector<8x32xf32> to vector<8x32xbf16>
    %cst_38 = arith.constant dense<0.000000e+00> : vector<8x128xf32>
    %185 = tpu.matmul %184, %2, %cst_38 {dimension_numbers = #tpu.dot_dimension_numbers<[1], [0], [0], [1], [0, 0, 1, 1], [], []>} : vector<8x32xbf16>, vector<32x128xbf16>, vector<8x128xf32> -> vector<8x128xf32>
    %186 = arith.addf %185, %5 : vector<8x128xf32>
    %cst_39 = arith.constant dense<0.000000e+00> : vector<8x128xf32>
    %187 = tpu.matmul %165, %1, %cst_39 {dimension_numbers = #tpu.dot_dimension_numbers<[1], [0], [0], [1], [0, 0, 1, 1], [], []>} : vector<8x32xbf16>, vector<32x128xbf16>, vector<8x128xf32> -> vector<8x128xf32>
    %188 = arith.addf %186, %187 : vector<8x128xf32>
    %189 = arith.negf %188 : vector<8x128xf32>
    %190 = math.exp %189 : vector<8x128xf32>
    %cst_40 = arith.constant 1.000000e+00 : f32
    %191 = vector.broadcast %cst_40 : f32 to vector<8x128xf32>
    %192 = arith.addf %191, %190 : vector<8x128xf32>
    %193 = arith.divf %191, %192 : vector<8x128xf32>
    %194 = math.tanh %188 : vector<8x128xf32>
    %195 = vector.extract_strided_slice %193 {offsets = [0, 0], sizes = [8, 32], strides = [1, 1]} : vector<8x128xf32> to vector<8x32xf32>
    %196 = vector.extract_strided_slice %193 {offsets = [0, 32], sizes = [8, 32], strides = [1, 1]} : vector<8x128xf32> to vector<8x32xf32>
    %197 = vector.extract_strided_slice %194 {offsets = [0, 64], sizes = [8, 32], strides = [1, 1]} : vector<8x128xf32> to vector<8x32xf32>
    %198 = vector.extract_strided_slice %193 {offsets = [0, 96], sizes = [8, 32], strides = [1, 1]} : vector<8x128xf32> to vector<8x32xf32>
    %199 = arith.mulf %196, %162 : vector<8x32xf32>
    %200 = arith.mulf %195, %197 : vector<8x32xf32>
    %201 = arith.addf %199, %200 : vector<8x32xf32>
    %202 = math.tanh %201 : vector<8x32xf32>
    %203 = arith.mulf %198, %202 : vector<8x32xf32>
    %204 = arith.truncf %203 : vector<8x32xf32> to vector<8x32xbf16>
    %c40 = arith.constant 40 : index
    %c0_41 = arith.constant 0 : index
    %205 = vector.load %arg0[%c40, %c0_41] : memref<64x128xf32, #tpu.memory_space<vmem>>, vector<8x128xf32>
    %cst_42 = arith.constant dense<0.000000e+00> : vector<8x128xf32>
    %206 = tpu.matmul %184, %0, %cst_42 {dimension_numbers = #tpu.dot_dimension_numbers<[1], [0], [0], [1], [0, 0, 1, 1], [], []>} : vector<8x32xbf16>, vector<32x128xbf16>, vector<8x128xf32> -> vector<8x128xf32>
    %207 = arith.addf %205, %206 : vector<8x128xf32>
    %208 = arith.negf %207 : vector<8x128xf32>
    %209 = math.exp %208 : vector<8x128xf32>
    %cst_43 = arith.constant 1.000000e+00 : f32
    %210 = vector.broadcast %cst_43 : f32 to vector<8x128xf32>
    %211 = arith.addf %210, %209 : vector<8x128xf32>
    %212 = arith.divf %210, %211 : vector<8x128xf32>
    %213 = math.tanh %207 : vector<8x128xf32>
    %214 = vector.extract_strided_slice %212 {offsets = [0, 0], sizes = [8, 32], strides = [1, 1]} : vector<8x128xf32> to vector<8x32xf32>
    %215 = vector.extract_strided_slice %212 {offsets = [0, 32], sizes = [8, 32], strides = [1, 1]} : vector<8x128xf32> to vector<8x32xf32>
    %216 = vector.extract_strided_slice %213 {offsets = [0, 64], sizes = [8, 32], strides = [1, 1]} : vector<8x128xf32> to vector<8x32xf32>
    %217 = vector.extract_strided_slice %212 {offsets = [0, 96], sizes = [8, 32], strides = [1, 1]} : vector<8x128xf32> to vector<8x32xf32>
    %218 = arith.mulf %215, %181 : vector<8x32xf32>
    %219 = arith.mulf %214, %216 : vector<8x32xf32>
    %220 = arith.addf %218, %219 : vector<8x32xf32>
    %221 = math.tanh %220 : vector<8x32xf32>
    %222 = arith.mulf %217, %221 : vector<8x32xf32>
    %223 = arith.truncf %222 : vector<8x32xf32> to vector<8x32xbf16>
    %cst_44 = arith.constant dense<0.000000e+00> : vector<8x128xf32>
    %224 = tpu.matmul %223, %2, %cst_44 {dimension_numbers = #tpu.dot_dimension_numbers<[1], [0], [0], [1], [0, 0, 1, 1], [], []>} : vector<8x32xbf16>, vector<32x128xbf16>, vector<8x128xf32> -> vector<8x128xf32>
    %225 = arith.addf %224, %5 : vector<8x128xf32>
    %cst_45 = arith.constant dense<0.000000e+00> : vector<8x128xf32>
    %226 = tpu.matmul %204, %1, %cst_45 {dimension_numbers = #tpu.dot_dimension_numbers<[1], [0], [0], [1], [0, 0, 1, 1], [], []>} : vector<8x32xbf16>, vector<32x128xbf16>, vector<8x128xf32> -> vector<8x128xf32>
    %227 = arith.addf %225, %226 : vector<8x128xf32>
    %228 = arith.negf %227 : vector<8x128xf32>
    %229 = math.exp %228 : vector<8x128xf32>
    %cst_46 = arith.constant 1.000000e+00 : f32
    %230 = vector.broadcast %cst_46 : f32 to vector<8x128xf32>
    %231 = arith.addf %230, %229 : vector<8x128xf32>
    %232 = arith.divf %230, %231 : vector<8x128xf32>
    %233 = math.tanh %227 : vector<8x128xf32>
    %234 = vector.extract_strided_slice %232 {offsets = [0, 0], sizes = [8, 32], strides = [1, 1]} : vector<8x128xf32> to vector<8x32xf32>
    %235 = vector.extract_strided_slice %232 {offsets = [0, 32], sizes = [8, 32], strides = [1, 1]} : vector<8x128xf32> to vector<8x32xf32>
    %236 = vector.extract_strided_slice %233 {offsets = [0, 64], sizes = [8, 32], strides = [1, 1]} : vector<8x128xf32> to vector<8x32xf32>
    %237 = vector.extract_strided_slice %232 {offsets = [0, 96], sizes = [8, 32], strides = [1, 1]} : vector<8x128xf32> to vector<8x32xf32>
    %238 = arith.mulf %235, %201 : vector<8x32xf32>
    %239 = arith.mulf %234, %236 : vector<8x32xf32>
    %240 = arith.addf %238, %239 : vector<8x32xf32>
    %241 = math.tanh %240 : vector<8x32xf32>
    %242 = arith.mulf %237, %241 : vector<8x32xf32>
    %243 = arith.truncf %242 : vector<8x32xf32> to vector<8x32xbf16>
    %c48 = arith.constant 48 : index
    %c0_47 = arith.constant 0 : index
    %244 = vector.load %arg0[%c48, %c0_47] : memref<64x128xf32, #tpu.memory_space<vmem>>, vector<8x128xf32>
    %cst_48 = arith.constant dense<0.000000e+00> : vector<8x128xf32>
    %245 = tpu.matmul %223, %0, %cst_48 {dimension_numbers = #tpu.dot_dimension_numbers<[1], [0], [0], [1], [0, 0, 1, 1], [], []>} : vector<8x32xbf16>, vector<32x128xbf16>, vector<8x128xf32> -> vector<8x128xf32>
    %246 = arith.addf %244, %245 : vector<8x128xf32>
    %247 = arith.negf %246 : vector<8x128xf32>
    %248 = math.exp %247 : vector<8x128xf32>
    %cst_49 = arith.constant 1.000000e+00 : f32
    %249 = vector.broadcast %cst_49 : f32 to vector<8x128xf32>
    %250 = arith.addf %249, %248 : vector<8x128xf32>
    %251 = arith.divf %249, %250 : vector<8x128xf32>
    %252 = math.tanh %246 : vector<8x128xf32>
    %253 = vector.extract_strided_slice %251 {offsets = [0, 0], sizes = [8, 32], strides = [1, 1]} : vector<8x128xf32> to vector<8x32xf32>
    %254 = vector.extract_strided_slice %251 {offsets = [0, 32], sizes = [8, 32], strides = [1, 1]} : vector<8x128xf32> to vector<8x32xf32>
    %255 = vector.extract_strided_slice %252 {offsets = [0, 64], sizes = [8, 32], strides = [1, 1]} : vector<8x128xf32> to vector<8x32xf32>
    %256 = vector.extract_strided_slice %251 {offsets = [0, 96], sizes = [8, 32], strides = [1, 1]} : vector<8x128xf32> to vector<8x32xf32>
    %257 = arith.mulf %254, %220 : vector<8x32xf32>
    %258 = arith.mulf %253, %255 : vector<8x32xf32>
    %259 = arith.addf %257, %258 : vector<8x32xf32>
    %260 = math.tanh %259 : vector<8x32xf32>
    %261 = arith.mulf %256, %260 : vector<8x32xf32>
    %262 = arith.truncf %261 : vector<8x32xf32> to vector<8x32xbf16>
    %cst_50 = arith.constant dense<0.000000e+00> : vector<8x128xf32>
    %263 = tpu.matmul %262, %2, %cst_50 {dimension_numbers = #tpu.dot_dimension_numbers<[1], [0], [0], [1], [0, 0, 1, 1], [], []>} : vector<8x32xbf16>, vector<32x128xbf16>, vector<8x128xf32> -> vector<8x128xf32>
    %264 = arith.addf %263, %5 : vector<8x128xf32>
    %cst_51 = arith.constant dense<0.000000e+00> : vector<8x128xf32>
    %265 = tpu.matmul %243, %1, %cst_51 {dimension_numbers = #tpu.dot_dimension_numbers<[1], [0], [0], [1], [0, 0, 1, 1], [], []>} : vector<8x32xbf16>, vector<32x128xbf16>, vector<8x128xf32> -> vector<8x128xf32>
    %266 = arith.addf %264, %265 : vector<8x128xf32>
    %267 = arith.negf %266 : vector<8x128xf32>
    %268 = math.exp %267 : vector<8x128xf32>
    %cst_52 = arith.constant 1.000000e+00 : f32
    %269 = vector.broadcast %cst_52 : f32 to vector<8x128xf32>
    %270 = arith.addf %269, %268 : vector<8x128xf32>
    %271 = arith.divf %269, %270 : vector<8x128xf32>
    %272 = math.tanh %266 : vector<8x128xf32>
    %273 = vector.extract_strided_slice %271 {offsets = [0, 0], sizes = [8, 32], strides = [1, 1]} : vector<8x128xf32> to vector<8x32xf32>
    %274 = vector.extract_strided_slice %271 {offsets = [0, 32], sizes = [8, 32], strides = [1, 1]} : vector<8x128xf32> to vector<8x32xf32>
    %275 = vector.extract_strided_slice %272 {offsets = [0, 64], sizes = [8, 32], strides = [1, 1]} : vector<8x128xf32> to vector<8x32xf32>
    %276 = vector.extract_strided_slice %271 {offsets = [0, 96], sizes = [8, 32], strides = [1, 1]} : vector<8x128xf32> to vector<8x32xf32>
    %277 = arith.mulf %274, %240 : vector<8x32xf32>
    %278 = arith.mulf %273, %275 : vector<8x32xf32>
    %279 = arith.addf %277, %278 : vector<8x32xf32>
    %280 = math.tanh %279 : vector<8x32xf32>
    %281 = arith.mulf %276, %280 : vector<8x32xf32>
    %282 = arith.truncf %281 : vector<8x32xf32> to vector<8x32xbf16>
    %c56 = arith.constant 56 : index
    %c0_53 = arith.constant 0 : index
    %283 = vector.load %arg0[%c56, %c0_53] : memref<64x128xf32, #tpu.memory_space<vmem>>, vector<8x128xf32>
    %cst_54 = arith.constant dense<0.000000e+00> : vector<8x128xf32>
    %284 = tpu.matmul %262, %0, %cst_54 {dimension_numbers = #tpu.dot_dimension_numbers<[1], [0], [0], [1], [0, 0, 1, 1], [], []>} : vector<8x32xbf16>, vector<32x128xbf16>, vector<8x128xf32> -> vector<8x128xf32>
    %285 = arith.addf %283, %284 : vector<8x128xf32>
    %286 = arith.negf %285 : vector<8x128xf32>
    %287 = math.exp %286 : vector<8x128xf32>
    %cst_55 = arith.constant 1.000000e+00 : f32
    %288 = vector.broadcast %cst_55 : f32 to vector<8x128xf32>
    %289 = arith.addf %288, %287 : vector<8x128xf32>
    %290 = arith.divf %288, %289 : vector<8x128xf32>
    %291 = math.tanh %285 : vector<8x128xf32>
    %292 = vector.extract_strided_slice %290 {offsets = [0, 0], sizes = [8, 32], strides = [1, 1]} : vector<8x128xf32> to vector<8x32xf32>
    %293 = vector.extract_strided_slice %290 {offsets = [0, 32], sizes = [8, 32], strides = [1, 1]} : vector<8x128xf32> to vector<8x32xf32>
    %294 = vector.extract_strided_slice %291 {offsets = [0, 64], sizes = [8, 32], strides = [1, 1]} : vector<8x128xf32> to vector<8x32xf32>
    %295 = vector.extract_strided_slice %290 {offsets = [0, 96], sizes = [8, 32], strides = [1, 1]} : vector<8x128xf32> to vector<8x32xf32>
    %296 = arith.mulf %293, %259 : vector<8x32xf32>
    %297 = arith.mulf %292, %294 : vector<8x32xf32>
    %298 = arith.addf %296, %297 : vector<8x32xf32>
    %299 = math.tanh %298 : vector<8x32xf32>
    %300 = arith.mulf %295, %299 : vector<8x32xf32>
    %301 = arith.truncf %300 : vector<8x32xf32> to vector<8x32xbf16>
    %cst_56 = arith.constant dense<0.000000e+00> : vector<8x128xf32>
    %302 = tpu.matmul %301, %2, %cst_56 {dimension_numbers = #tpu.dot_dimension_numbers<[1], [0], [0], [1], [0, 0, 1, 1], [], []>} : vector<8x32xbf16>, vector<32x128xbf16>, vector<8x128xf32> -> vector<8x128xf32>
    %303 = arith.addf %302, %5 : vector<8x128xf32>
    %cst_57 = arith.constant dense<0.000000e+00> : vector<8x128xf32>
    %304 = tpu.matmul %282, %1, %cst_57 {dimension_numbers = #tpu.dot_dimension_numbers<[1], [0], [0], [1], [0, 0, 1, 1], [], []>} : vector<8x32xbf16>, vector<32x128xbf16>, vector<8x128xf32> -> vector<8x128xf32>
    %305 = arith.addf %303, %304 : vector<8x128xf32>
    %306 = arith.negf %305 : vector<8x128xf32>
    %307 = math.exp %306 : vector<8x128xf32>
    %cst_58 = arith.constant 1.000000e+00 : f32
    %308 = vector.broadcast %cst_58 : f32 to vector<8x128xf32>
    %309 = arith.addf %308, %307 : vector<8x128xf32>
    %310 = arith.divf %308, %309 : vector<8x128xf32>
    %311 = math.tanh %305 : vector<8x128xf32>
    %312 = vector.extract_strided_slice %310 {offsets = [0, 0], sizes = [8, 32], strides = [1, 1]} : vector<8x128xf32> to vector<8x32xf32>
    %313 = vector.extract_strided_slice %310 {offsets = [0, 32], sizes = [8, 32], strides = [1, 1]} : vector<8x128xf32> to vector<8x32xf32>
    %314 = vector.extract_strided_slice %311 {offsets = [0, 64], sizes = [8, 32], strides = [1, 1]} : vector<8x128xf32> to vector<8x32xf32>
    %315 = vector.extract_strided_slice %310 {offsets = [0, 96], sizes = [8, 32], strides = [1, 1]} : vector<8x128xf32> to vector<8x32xf32>
    %316 = arith.mulf %313, %279 : vector<8x32xf32>
    %317 = arith.mulf %312, %314 : vector<8x32xf32>
    %318 = arith.addf %316, %317 : vector<8x32xf32>
    %319 = math.tanh %318 : vector<8x32xf32>
    %320 = arith.mulf %315, %319 : vector<8x32xf32>
    %321 = arith.truncf %320 : vector<8x32xf32> to vector<8x32xbf16>
    %c0_59 = arith.constant 0 : index
    %c0_60 = arith.constant 0 : index
    %322 = vector.load %arg5[%c0_59, %c0_60] : memref<32x128xbf16, #tpu.memory_space<vmem>>, vector<32x128xbf16>
    %cst_61 = arith.constant dense<0.000000e+00> : vector<8x128xf32>
    %323 = tpu.matmul %321, %322, %cst_61 {dimension_numbers = #tpu.dot_dimension_numbers<[1], [0], [0], [1], [0, 0, 1, 1], [], []>} : vector<8x32xbf16>, vector<32x128xbf16>, vector<8x128xf32> -> vector<8x128xf32>
    %c0_62 = arith.constant 0 : index
    %c0_63 = arith.constant 0 : index
    %324 = vector.load %arg6[%c0_62, %c0_63] : memref<1x128xf32, #tpu.memory_space<vmem>>, vector<1x128xf32>
    %325 = vector.broadcast %324 : vector<1x128xf32> to vector<8x128xf32>
    %326 = arith.addf %323, %325 : vector<8x128xf32>
    %c0_64 = arith.constant 0 : index
    %c0_65 = arith.constant 0 : index
    %327 = vector.load %arg7[%c0_64, %c0_65] : memref<8x128xf32, #tpu.memory_space<vmem>>, vector<8x128xf32>
    tpu.vector_store %arg7[%c0_64, %c0_65], %326 {strides = array<i32>} : memref<8x128xf32, #tpu.memory_space<vmem>>, vector<8x128xf32>,
    return
  }
}

</mosaic_0001>

<bundles_post_ra>
// kernel: lstm_model_forward.1
= control target key start
LH: loop header
LB: loop body
LE: loop exit
PB: predicated region body
PF: predicated region fallthrough
CT: control target
= control target key end

     0   :  { %v2104_v0 = vmov 0.0   ;;  %vm2105_vm0 = vmmov 0   ;;  %v2106_v3 = vmov 0   ;;  %s2107_s30 = smov 64   ;;  %s2108_s8 = smov 32   ;;  %vm59_vm1 = vcmask 261120   ;;  %s2525_s1 = inlined_call_operand.vmem [shape: bf16[32,128], index: 1, kind: input, shape index: {}]   ;;  %s2526_s0 = inlined_call_operand.vmem [shape: f32[64,128], index: 0, kind: input, shape index: {}]   ;;  %s2527_s2 = inlined_call_operand.vmem [shape: bf16[32,128], index: 2, kind: input, shape index: {}]   ;;  %s2528_s4 = inlined_call_operand.vmem [shape: bf16[32,128], index: 4, kind: input, shape index: {}]   ;;  %s2529_s3 = inlined_call_operand.vmem [shape: f32[1,128], index: 3, kind: input, shape index: {}]   ;;  %s2530_s5 = inlined_call_operand.vmem [shape: bf16[32,128], index: 5, kind: input, shape index: {}]   ;;  %s2531_s6 = inlined_call_operand.vmem [shape: f32[1,128], index: 6, kind: input, shape index: {}]   ;;  %s2532_s7 = inlined_call_operand.vmem [shape: f32[8,128], index: 7, kind: output, shape index: {}]  }
   0x1   :  { %1758 = vmatprep.subr.bf16.mxu0 %v2104_v0  ;;  %v2153_v1 = vld [vmem:[%s2525_s1 + $0x8] sm:$0xff]   ;;  %1762 = vmatprep.mubr.msk.bf16.mxu0 %vm2105_vm0, %v2104_v0  ;;  %v2164_v2 = vld [vmem:[%s2525_s1] sm:$0xff]  }
   0x2   :  { %1766 = vmatprep.subr.bf16.mxu1 %v2104_v0  ;;  %1770 = vmatprep.mubr.msk.bf16.mxu1 %vm2105_vm0, %v2104_v0  ;;  %v46_v4 = vld [vmem:[%s2526_s0] sm:$0xff]  ;;  %v2182_v20 = vld [vmem:[%s2527_s2 + $0x8] sm:$0xff]  }
   0x3   :  { %1759 = vmatpush3.bf16.msra.mxu0 %v2153_v1  ;;  %v2187_v21 = vld [vmem:[%s2528_s4 + $0x8] sm:$0xff]   ;;  %1767 = vmatpush3.bf16.msra.mxu1 %v2182_v20  ;;  %v2193_v22 = vld [vmem:[%s2527_s2] sm:$0xff]  }
   0x4   :  { %1760 = vmatprep.subr.bf16.mxu0 %v2104_v0  ;;  %1768 = vmatprep.subr.bf16.mxu1 %v2104_v0  ;;  %v2200_v23 = vld [vmem:[%s2528_s4] sm:$0xff]   ;;  %v265_v40 = vld [vmem:[%s2526_s0 + $0x8] sm:$0xff] }
   0x5   :  { %v2232_v33 = vld [vmem:[%s2529_s3] ss:$0 sm:$0xff] }
   0x7   :  { %1761 = vmatpush3.bf16.msra.mxu0 %v2164_v2  ;;  %1769 = vmatpush3.bf16.msra.mxu1 %v2193_v22 }
   0x8   :  { %1774 = vmatprep.subr.bf16.mxu0 %v2104_v0  ;;  %1782 = vmatprep.subr.bf16.mxu1 %v2104_v0 }
   0xa   :  { %1763 = vmatmul.mubr.bf16.vlgmr.msra.gmra.mxu0 %v2106_v3 }
   0xb   :  { %1778 = vmatprep.mubr.msk.bf16.mxu0 %vm2105_vm0, %v2104_v0  ;;  %1775 = vmatpush3.bf16.msra.mxu0 %v2187_v21 }
   0xc   :  { %1776 = vmatprep.subr.bf16.mxu0 %v2104_v0 }
   0xf   :  { %1777 = vmatpush3.bf16.msra.mxu0 %v2200_v23 }
  0x10   :  { %1790 = vmatprep.subr.bf16.mxu0 %v2104_v0 }
  0x12   :  { %1779 = vmatmul.mubr.bf16.vlgmr.msra.gmra.mxu0 %v2106_v3 }
  0x13   :  { %1791 = vmatpush3.bf16.msra.mxu0 %v2182_v20  ;;  %1794 = vmatprep.mubr.msk.bf16.mxu0 %vm2105_vm0, %v2104_v0 }
  0x14   :  { %1792 = vmatprep.subr.bf16.mxu0 %v2104_v0 }
  0x17   :  { %1793 = vmatpush3.bf16.msra.mxu0 %v2193_v22 }
  0x18   :  { %1806 = vmatprep.subr.bf16.mxu0 %v2104_v0 }
  0xca   :  { %v97_v5 = vpop.f32.mrf.mxu0 }
  0xcb   :  { %v103_v6 = vadd.f32 %v97_v5, %v46_v4 }
  0xcc   :  { %v1764_v7 = vpop.f32.mrf.mxu0 }
  0xcd   :  { %1971 = vtanh.f32 %v103_v6  ;;  %v1637_v11 = vmul.f32 -1.442695, %v103_v6 }
  0xce   :  { %v100_v8 = vpop.f32.mrf.mxu0 }
  0xcf   :  { %1973 = vpow2.f32 %v1637_v11 }
  0xd0   :  { %v1765_v9 = vpop.f32.mrf.mxu0 }
  0xd2   :  { %v233_v29 = vpop.f32.mrf.mxu0 }
  0xd4   :  { %v1780_v30 = vpop.f32.mrf.mxu0 }
  0xd6   :  { %v236_v31 = vpop.f32.mrf.mxu0 }
  0xd8   :  { %v1781_v32 = vpop.f32.mrf.mxu0 }
  0xda   :  { %v1972_v10 = vpop.eup %1971 }
  0xdb   :  { %113 = vrot.lane.b32.xlu0 %v1972_v10, %s2107_s30 }
  0xdc   :  { %v1974_v12 = vpop.eup %1973 }
  0xdd   :  { %v107_v13 = vadd.f32 1.0, %v1974_v12 }
  0xdf   :  { %1975 = vrcp.f32 %v107_v13 }
  0xec   :  { %v1976_v14 = vpop.eup %1975 }
  0xed   :  { %v111_v17 = vmul.f32 0.0, %v1976_v14 }
 0x14d   :  { %v114_v15 = vpop.permute.xlu0 %113 }
 0x14e   :  { %v116_v16 = vmul.f32 %v1976_v14, %v114_v15 }
 0x150   :  { %118 = vrot.lane.b32.xlu0 %v116_v16, %s2108_s8 }
 0x1c2   :  { %v119_v18 = vpop.permute.xlu0 %118 }
 0x1c3   :  { %v2176_v19 = vadd.f32 %v119_v18, %v111_v17 }
 0x1c5   :  { %1977 = vtanh.f32 %v2176_v19 }
 0x1d2   :  { %v1978_v24 = vpop.eup %1977 }
 0x1d3   :  { %124 = vrot.lane.b32.xlu1 %v1978_v24, %s2107_s30 }
 0x245   :  { %v125_v25 = vpop.permute.xlu1 %124 }
 0x246   :  { %v127_v26 = vmul.f32 %v1976_v14, %v125_v25 }
 0x248   :  { %v128_v27 = vpack.c.bf16 %v127_v26, %v127_v26 }
 0x24a   :  { %130 = vrot.lane.b32.xlu1 %v128_v27, %s2108_s8 }
 0x2bc   :  { %v131_v28 = vpop.permute.xlu1 %130 }
 0x2bd   :  { %1771 = vmatmul.mubr.msk.bf16.vlgmr.msra.gmra.mxu1 %vm59_vm1, %v131_v28 }
 0x2be   :  { %1783 = vmatpush3.bf16.msra.mxu1 %v2153_v1  ;;  %1786 = vmatprep.mubr.msk.bf16.mxu1 %vm2105_vm0, %v2104_v0 }
 0x2bf   :  { %1784 = vmatprep.subr.bf16.mxu1 %v2104_v0 }
 0x2c2   :  { %1785 = vmatpush3.bf16.msra.mxu1 %v2164_v2 }
 0x2c3   :  { %1798 = vmatprep.subr.bf16.mxu1 %v2104_v0 }
 0x2c5   :  { %1787 = vmatmul.mubr.msk.bf16.vlgmr.msra.gmra.mxu1 %vm59_vm1, %v131_v28 }
 0x2c6   :  { %1799 = vmatpush3.bf16.msra.mxu1 %v2187_v21  ;;  %1802 = vmatprep.mubr.msk.bf16.mxu1 %vm2105_vm0, %v2104_v0 }
 0x2c7   :  { %1800 = vmatprep.subr.bf16.mxu1 %v2104_v0 }
 0x2ca   :  { %1801 = vmatpush3.bf16.msra.mxu1 %v2200_v23 }
 0x2cb   :  { %1814 = vmatprep.subr.bf16.mxu1 %v2104_v0 }
 0x37d   :  { %v181_v34 = vpop.f32.mrf.mxu1 }
 0x37e   :  { %v182_v35 = vadd.f32 %v2232_v33, %v181_v34 }
 0x37f   :  { %v1772_v36 = vpop.f32.mrf.mxu1 }
 0x380   :  { %v239_v37 = vadd.f32 %v233_v29, %v182_v35  ;;  %v450_v29 = vld [vmem:[%s2526_s0 + $0x10] sm:$0xff] }
 0x381   :  { %v184_v38 = vpop.f32.mrf.mxu1 }
 0x382   :  { %1979 = vtanh.f32 %v239_v37  ;;  %v1643_v48 = vmul.f32 -1.442695, %v239_v37 }
 0x383   :  { %v1773_v39 = vpop.f32.mrf.mxu1 }
 0x385   :  { %v300_v41 = vpop.f32.mrf.mxu1 }
 0x386   :  { %v306_v42 = vadd.f32 %v300_v41, %v265_v40 }
 0x387   :  { %v1788_v43 = vpop.f32.mrf.mxu1 }
 0x388   :  { %1981 = vtanh.f32 %v306_v42  ;;  %v1645_v49 = vmul.f32 -1.442695, %v306_v42 }
 0x389   :  { %v303_v44 = vpop.f32.mrf.mxu1  ;;  %1983 = vpow2.f32 %v1643_v48 }
 0x38a   :  { %1985 = vpow2.f32 %v1645_v49 }
 0x38b   :  { %v1789_v45 = vpop.f32.mrf.mxu1 }
 0x38f   :  { %v1980_v46 = vpop.eup %1979 }
 0x390   :  { %249 = vrot.lane.b32.xlu1 %v1980_v46, %s2107_s30 }
 0x395   :  { %v1982_v47 = vpop.eup %1981 }
 0x396   :  { %316 = vrot.lane.b32.xlu0 %v1982_v47, %s2107_s30  ;;  %v1984_v50 = vpop.eup %1983 }
 0x397   :  { %v243_v51 = vadd.f32 1.0, %v1984_v50  ;;  %v1986_v52 = vpop.eup %1985 }
 0x398   :  { %v310_v53 = vadd.f32 1.0, %v1986_v52 }
 0x399   :  { %1987 = vrcp.f32 %v243_v51 }
 0x39a   :  { %1989 = vrcp.f32 %v310_v53 }
 0x3a6   :  { %v1988_v54 = vpop.eup %1987 }
 0x3a7   :  { %v1990_v57 = vpop.eup %1989  ;;  %v247_v60 = vmul.f32 0.0, %v1988_v54 }
 0x3a8   :  { %v314_v63 = vmul.f32 %v1990_v57, %v2176_v19 }
 0x402   :  { %v250_v55 = vpop.permute.xlu1 %249 }
 0x403   :  { %v252_v56 = vmul.f32 %v1988_v54, %v250_v55 }
 0x405   :  { %254 = vrot.lane.b32.xlu1 %v252_v56, %s2108_s8 }
 0x408   :  { %v317_v58 = vpop.permute.xlu0 %316 }
 0x409   :  { %v319_v59 = vmul.f32 %v1990_v57, %v317_v58 }
 0x40b   :  { %321 = vrot.lane.b32.xlu0 %v319_v59, %s2108_s8 }
 0x477   :  { %v255_v61 = vpop.permute.xlu1 %254 }
 0x478   :  { %v2242_v62 = vadd.f32 %v255_v61, %v247_v60 }
 0x47a   :  { %1991 = vtanh.f32 %v2242_v62 }
 0x47d   :  { %v322_v3 = vpop.permute.xlu0 %321 }
 0x47e   :  { %v2246_v4 = vadd.f32 %v322_v3, %v314_v63 }
 0x480   :  { %1993 = vtanh.f32 %v2246_v4 }
 0x487   :  { %v1992_v5 = vpop.eup %1991 }
 0x488   :  { %260 = vrot.lane.b32.xlu1 %v1992_v5, %s2107_s30 }
 0x48d   :  { %v1994_v6 = vpop.eup %1993 }
 0x48e   :  { %327 = vrot.lane.b32.xlu0 %v1994_v6, %s2107_s30 }
 0x4fa   :  { %v261_v7 = vpop.permute.xlu1 %260 }
 0x4fb   :  { %v263_v8 = vmul.f32 %v1988_v54, %v261_v7 }
 0x4fd   :  { %v264_v9 = vpack.c.bf16 %v263_v8, %v263_v8 }
 0x4ff   :  { %379 = vrot.lane.b32.xlu1 %v264_v9, %s2108_s8 }
 0x500   :  { %v328_v10 = vpop.permute.xlu0 %327 }
 0x501   :  { %v330_v11 = vmul.f32 %v1990_v57, %v328_v10 }
 0x503   :  { %v331_v12 = vpack.c.bf16 %v330_v11, %v330_v11 }
 0x505   :  { %333 = vrot.lane.b32.xlu0 %v331_v12, %s2108_s8 }
 0x571   :  { %v380_v13 = vpop.permute.xlu1 %379 }
 0x572   :  { %1803 = vmatmul.mubr.msk.bf16.vlgmr.msra.gmra.mxu1 %vm59_vm1, %v380_v13 }
 0x573   :  { %1815 = vmatpush3.bf16.msra.mxu1 %v2182_v20  ;;  %1818 = vmatprep.mubr.msk.bf16.mxu1 %vm2105_vm0, %v2104_v0 }
 0x574   :  { %1816 = vmatprep.subr.bf16.mxu1 %v2104_v0 }
 0x577   :  { %v334_v14 = vpop.permute.xlu0 %333  ;;  %1817 = vmatpush3.bf16.msra.mxu1 %v2193_v22 }
 0x578   :  { %1795 = vmatmul.mubr.msk.bf16.vlgmr.msra.gmra.mxu0 %vm59_vm1, %v334_v14  ;;  %1830 = vmatprep.subr.bf16.mxu1 %v2104_v0 }
 0x579   :  { %1807 = vmatpush3.bf16.msra.mxu0 %v2153_v1  ;;  %1810 = vmatprep.mubr.msk.bf16.mxu0 %vm2105_vm0, %v2104_v0 }
 0x57a   :  { %1808 = vmatprep.subr.bf16.mxu0 %v2104_v0 }
 0x57d   :  { %1809 = vmatpush3.bf16.msra.mxu0 %v2164_v2 }
 0x57e   :  { %1822 = vmatprep.subr.bf16.mxu0 %v2104_v0 }
 0x580   :  { %1811 = vmatmul.mubr.msk.bf16.vlgmr.msra.gmra.mxu0 %vm59_vm1, %v334_v14 }
 0x581   :  { %1823 = vmatpush3.bf16.msra.mxu0 %v2187_v21  ;;  %1826 = vmatprep.mubr.msk.bf16.mxu0 %vm2105_vm0, %v2104_v0 }
 0x582   :  { %1824 = vmatprep.subr.bf16.mxu0 %v2104_v0 }
 0x585   :  { %1825 = vmatpush3.bf16.msra.mxu0 %v2200_v23 }
 0x586   :  { %1838 = vmatprep.subr.bf16.mxu0 %v2104_v0 }
 0x632   :  { %v418_v15 = vpop.f32.mrf.mxu1 }
 0x634   :  { %v1804_v16 = vpop.f32.mrf.mxu1 }
 0x636   :  { %v421_v17 = vpop.f32.mrf.mxu1 }
 0x638   :  { %v372_v18 = vpop.f32.mrf.mxu0  ;;  %v1805_v19 = vpop.f32.mrf.mxu1 }
 0x639   :  { %v373_v24 = vadd.f32 %v2232_v33, %v372_v18 }
 0x63a   :  { %v1796_v25 = vpop.f32.mrf.mxu0 }
 0x63b   :  { %v424_v26 = vadd.f32 %v418_v15, %v373_v24  ;;  %v635_v15 = vld [vmem:[%s2526_s0 + $0x18] sm:$0xff] }
 0x63c   :  { %v375_v27 = vpop.f32.mrf.mxu0 }
 0x63d   :  { %1995 = vtanh.f32 %v424_v26  ;;  %v1648_v38 = vmul.f32 -1.442695, %v424_v26 }
 0x63e   :  { %v1797_v28 = vpop.f32.mrf.mxu0 }
 0x640   :  { %v485_v30 = vpop.f32.mrf.mxu0 }
 0x641   :  { %v491_v31 = vadd.f32 %v485_v30, %v450_v29 }
 0x642   :  { %v1812_v32 = vpop.f32.mrf.mxu0 }
 0x643   :  { %1997 = vtanh.f32 %v491_v31  ;;  %v1650_v39 = vmul.f32 -1.442695, %v491_v31 }
 0x644   :  { %v488_v34 = vpop.f32.mrf.mxu0  ;;  %1999 = vpow2.f32 %v1648_v38 }
 0x645   :  { %2001 = vpow2.f32 %v1650_v39 }
 0x646   :  { %v1813_v35 = vpop.f32.mrf.mxu0 }
 0x64a   :  { %v1996_v36 = vpop.eup %1995 }
 0x64b   :  { %434 = vrot.lane.b32.xlu1 %v1996_v36, %s2107_s30 }
 0x650   :  { %v1998_v37 = vpop.eup %1997 }
 0x651   :  { %501 = vrot.lane.b32.xlu0 %v1998_v37, %s2107_s30  ;;  %v2000_v40 = vpop.eup %1999 }
 0x652   :  { %v428_v41 = vadd.f32 1.0, %v2000_v40  ;;  %v2002_v42 = vpop.eup %2001 }
 0x653   :  { %v495_v43 = vadd.f32 1.0, %v2002_v42 }
 0x654   :  { %2003 = vrcp.f32 %v428_v41 }
 0x655   :  { %2005 = vrcp.f32 %v495_v43 }
 0x661   :  { %v2004_v44 = vpop.eup %2003 }
 0x662   :  { %v2006_v47 = vpop.eup %2005  ;;  %v432_v50 = vmul.f32 %v2004_v44, %v2242_v62 }
 0x663   :  { %v499_v53 = vmul.f32 %v2006_v47, %v2246_v4 }
 0x6bd   :  { %v435_v45 = vpop.permute.xlu1 %434 }
 0x6be   :  { %v437_v46 = vmul.f32 %v2004_v44, %v435_v45 }
 0x6c0   :  { %439 = vrot.lane.b32.xlu1 %v437_v46, %s2108_s8 }
 0x6c3   :  { %v502_v48 = vpop.permute.xlu0 %501 }
 0x6c4   :  { %v504_v49 = vmul.f32 %v2006_v47, %v502_v48 }
 0x6c6   :  { %506 = vrot.lane.b32.xlu0 %v504_v49, %s2108_s8 }
 0x732   :  { %v440_v51 = vpop.permute.xlu1 %439 }
 0x733   :  { %v2283_v52 = vadd.f32 %v440_v51, %v432_v50 }
 0x735   :  { %2007 = vtanh.f32 %v2283_v52 }
 0x738   :  { %v507_v54 = vpop.permute.xlu0 %506 }
 0x739   :  { %v2287_v55 = vadd.f32 %v507_v54, %v499_v53 }
 0x73b   :  { %2009 = vtanh.f32 %v2287_v55 }
 0x742   :  { %v2008_v56 = vpop.eup %2007 }
 0x743   :  { %445 = vrot.lane.b32.xlu1 %v2008_v56, %s2107_s30 }
 0x748   :  { %v2010_v57 = vpop.eup %2009 }
 0x749   :  { %512 = vrot.lane.b32.xlu0 %v2010_v57, %s2107_s30 }
 0x7b5   :  { %v446_v58 = vpop.permute.xlu1 %445 }
 0x7b6   :  { %v448_v59 = vmul.f32 %v2004_v44, %v446_v58 }
 0x7b8   :  { %v449_v60 = vpack.c.bf16 %v448_v59, %v448_v59 }
 0x7ba   :  { %564 = vrot.lane.b32.xlu1 %v449_v60, %s2108_s8 }
 0x7bb   :  { %v513_v61 = vpop.permute.xlu0 %512 }
 0x7bc   :  { %v515_v62 = vmul.f32 %v2006_v47, %v513_v61 }
 0x7be   :  { %v516_v63 = vpack.c.bf16 %v515_v62, %v515_v62 }
 0x7c0   :  { %518 = vrot.lane.b32.xlu0 %v516_v63, %s2108_s8 }
 0x82c   :  { %v565_v3 = vpop.permute.xlu1 %564 }
 0x82d   :  { %1827 = vmatmul.mubr.msk.bf16.vlgmr.msra.gmra.mxu0 %vm59_vm1, %v565_v3 }
 0x82e   :  { %1839 = vmatpush3.bf16.msra.mxu0 %v2182_v20  ;;  %1842 = vmatprep.mubr.msk.bf16.mxu0 %vm2105_vm0, %v2104_v0 }
 0x82f   :  { %1840 = vmatprep.subr.bf16.mxu0 %v2104_v0 }
 0x832   :  { %v519_v4 = vpop.permute.xlu0 %518  ;;  %1841 = vmatpush3.bf16.msra.mxu0 %v2193_v22 }
 0x833   :  { %1819 = vmatmul.mubr.msk.bf16.vlgmr.msra.gmra.mxu1 %vm59_vm1, %v519_v4  ;;  %1854 = vmatprep.subr.bf16.mxu0 %v2104_v0 }
 0x834   :  { %1831 = vmatpush3.bf16.msra.mxu1 %v2153_v1  ;;  %1834 = vmatprep.mubr.msk.bf16.mxu1 %vm2105_vm0, %v2104_v0 }
 0x835   :  { %1832 = vmatprep.subr.bf16.mxu1 %v2104_v0 }
 0x838   :  { %1833 = vmatpush3.bf16.msra.mxu1 %v2164_v2 }
 0x839   :  { %1846 = vmatprep.subr.bf16.mxu1 %v2104_v0 }
 0x83b   :  { %1835 = vmatmul.mubr.msk.bf16.vlgmr.msra.gmra.mxu1 %vm59_vm1, %v519_v4 }
 0x83c   :  { %1847 = vmatpush3.bf16.msra.mxu1 %v2187_v21  ;;  %1850 = vmatprep.mubr.msk.bf16.mxu1 %vm2105_vm0, %v2104_v0 }
 0x83d   :  { %1848 = vmatprep.subr.bf16.mxu1 %v2104_v0 }
 0x840   :  { %1849 = vmatpush3.bf16.msra.mxu1 %v2200_v23 }
 0x841   :  { %1862 = vmatprep.subr.bf16.mxu1 %v2104_v0 }
 0x8ed   :  { %v603_v5 = vpop.f32.mrf.mxu0 }
 0x8ef   :  { %v1828_v6 = vpop.f32.mrf.mxu0 }
 0x8f1   :  { %v606_v7 = vpop.f32.mrf.mxu0 }
 0x8f3   :  { %v557_v8 = vpop.f32.mrf.mxu1  ;;  %v1829_v9 = vpop.f32.mrf.mxu0 }
 0x8f4   :  { %v558_v10 = vadd.f32 %v2232_v33, %v557_v8 }
 0x8f5   :  { %v1820_v11 = vpop.f32.mrf.mxu1 }
 0x8f6   :  { %v609_v12 = vadd.f32 %v603_v5, %v558_v10  ;;  %v820_v5 = vld [vmem:[%s2526_s0 + $0x20] sm:$0xff] }
 0x8f7   :  { %v560_v13 = vpop.f32.mrf.mxu1 }
 0x8f8   :  { %2011 = vtanh.f32 %v609_v12  ;;  %v1653_v27 = vmul.f32 -1.442695, %v609_v12 }
 0x8f9   :  { %v1821_v14 = vpop.f32.mrf.mxu1 }
 0x8fb   :  { %v670_v16 = vpop.f32.mrf.mxu1 }
 0x8fc   :  { %v676_v17 = vadd.f32 %v670_v16, %v635_v15 }
 0x8fd   :  { %v1836_v18 = vpop.f32.mrf.mxu1 }
 0x8fe   :  { %2013 = vtanh.f32 %v676_v17  ;;  %v1655_v28 = vmul.f32 -1.442695, %v676_v17 }
 0x8ff   :  { %v673_v19 = vpop.f32.mrf.mxu1  ;;  %2015 = vpow2.f32 %v1653_v27 }
 0x900   :  { %2017 = vpow2.f32 %v1655_v28 }
 0x901   :  { %v1837_v24 = vpop.f32.mrf.mxu1 }
 0x905   :  { %v2012_v25 = vpop.eup %2011 }
 0x906   :  { %619 = vrot.lane.b32.xlu1 %v2012_v25, %s2107_s30 }
 0x90b   :  { %v2014_v26 = vpop.eup %2013 }
 0x90c   :  { %686 = vrot.lane.b32.xlu0 %v2014_v26, %s2107_s30  ;;  %v2016_v29 = vpop.eup %2015 }
 0x90d   :  { %v613_v30 = vadd.f32 1.0, %v2016_v29  ;;  %v2018_v31 = vpop.eup %2017 }
 0x90e   :  { %v680_v32 = vadd.f32 1.0, %v2018_v31 }
 0x90f   :  { %2019 = vrcp.f32 %v613_v30 }
 0x910   :  { %2021 = vrcp.f32 %v680_v32 }
 0x91c   :  { %v2020_v34 = vpop.eup %2019 }
 0x91d   :  { %v2022_v37 = vpop.eup %2021  ;;  %v617_v40 = vmul.f32 %v2020_v34, %v2283_v52 }
 0x91e   :  { %v684_v43 = vmul.f32 %v2022_v37, %v2287_v55 }
 0x978   :  { %v620_v35 = vpop.permute.xlu1 %619 }
 0x979   :  { %v622_v36 = vmul.f32 %v2020_v34, %v620_v35 }
 0x97b   :  { %624 = vrot.lane.b32.xlu1 %v622_v36, %s2108_s8 }
 0x97e   :  { %v687_v38 = vpop.permute.xlu0 %686 }
 0x97f   :  { %v689_v39 = vmul.f32 %v2022_v37, %v687_v38 }
 0x981   :  { %691 = vrot.lane.b32.xlu0 %v689_v39, %s2108_s8 }
 0x9ed   :  { %v625_v41 = vpop.permute.xlu1 %624 }
 0x9ee   :  { %v2324_v42 = vadd.f32 %v625_v41, %v617_v40 }
 0x9f0   :  { %2023 = vtanh.f32 %v2324_v42 }
 0x9f3   :  { %v692_v44 = vpop.permute.xlu0 %691 }
 0x9f4   :  { %v2328_v45 = vadd.f32 %v692_v44, %v684_v43 }
 0x9f6   :  { %2025 = vtanh.f32 %v2328_v45 }
 0x9fd   :  { %v2024_v46 = vpop.eup %2023 }
 0x9fe   :  { %630 = vrot.lane.b32.xlu1 %v2024_v46, %s2107_s30 }
 0xa03   :  { %v2026_v47 = vpop.eup %2025 }
 0xa04   :  { %697 = vrot.lane.b32.xlu0 %v2026_v47, %s2107_s30 }
 0xa70   :  { %v631_v48 = vpop.permute.xlu1 %630 }
 0xa71   :  { %v633_v49 = vmul.f32 %v2020_v34, %v631_v48 }
 0xa73   :  { %v634_v50 = vpack.c.bf16 %v633_v49, %v633_v49 }
 0xa75   :  { %749 = vrot.lane.b32.xlu1 %v634_v50, %s2108_s8 }
 0xa76   :  { %v698_v51 = vpop.permute.xlu0 %697 }
 0xa77   :  { %v700_v52 = vmul.f32 %v2022_v37, %v698_v51 }
 0xa79   :  { %v701_v53 = vpack.c.bf16 %v700_v52, %v700_v52 }
 0xa7b   :  { %703 = vrot.lane.b32.xlu0 %v701_v53, %s2108_s8 }
 0xae7   :  { %v750_v54 = vpop.permute.xlu1 %749 }
 0xae8   :  { %1851 = vmatmul.mubr.msk.bf16.vlgmr.msra.gmra.mxu1 %vm59_vm1, %v750_v54 }
 0xae9   :  { %1863 = vmatpush3.bf16.msra.mxu1 %v2182_v20  ;;  %1866 = vmatprep.mubr.msk.bf16.mxu1 %vm2105_vm0, %v2104_v0 }
 0xaea   :  { %1864 = vmatprep.subr.bf16.mxu1 %v2104_v0 }
 0xaed   :  { %v704_v55 = vpop.permute.xlu0 %703  ;;  %1865 = vmatpush3.bf16.msra.mxu1 %v2193_v22 }
 0xaee   :  { %1843 = vmatmul.mubr.msk.bf16.vlgmr.msra.gmra.mxu0 %vm59_vm1, %v704_v55  ;;  %1878 = vmatprep.subr.bf16.mxu1 %v2104_v0 }
 0xaef   :  { %1855 = vmatpush3.bf16.msra.mxu0 %v2153_v1  ;;  %1858 = vmatprep.mubr.msk.bf16.mxu0 %vm2105_vm0, %v2104_v0 }
 0xaf0   :  { %1856 = vmatprep.subr.bf16.mxu0 %v2104_v0 }
 0xaf3   :  { %1857 = vmatpush3.bf16.msra.mxu0 %v2164_v2 }
 0xaf4   :  { %1870 = vmatprep.subr.bf16.mxu0 %v2104_v0 }
 0xaf6   :  { %1859 = vmatmul.mubr.msk.bf16.vlgmr.msra.gmra.mxu0 %vm59_vm1, %v704_v55 }
 0xaf7   :  { %1871 = vmatpush3.bf16.msra.mxu0 %v2187_v21  ;;  %1874 = vmatprep.mubr.msk.bf16.mxu0 %vm2105_vm0, %v2104_v0 }
 0xaf8   :  { %1872 = vmatprep.subr.bf16.mxu0 %v2104_v0 }
 0xafb   :  { %1873 = vmatpush3.bf16.msra.mxu0 %v2200_v23 }
 0xafc   :  { %1886 = vmatprep.subr.bf16.mxu0 %v2104_v0 }
 0xba8   :  { %v788_v56 = vpop.f32.mrf.mxu1 }
 0xbaa   :  { %v1852_v57 = vpop.f32.mrf.mxu1 }
 0xbac   :  { %v791_v58 = vpop.f32.mrf.mxu1 }
 0xbae   :  { %v742_v59 = vpop.f32.mrf.mxu0  ;;  %v1853_v60 = vpop.f32.mrf.mxu1 }
 0xbaf   :  { %v743_v61 = vadd.f32 %v2232_v33, %v742_v59 }
 0xbb0   :  { %v1844_v62 = vpop.f32.mrf.mxu0 }
 0xbb1   :  { %v794_v63 = vadd.f32 %v788_v56, %v743_v61  ;;  %v1005_v56 = vld [vmem:[%s2526_s0 + $0x28] sm:$0xff] }
 0xbb2   :  { %v745_v3 = vpop.f32.mrf.mxu0 }
 0xbb3   :  { %2027 = vtanh.f32 %v794_v63  ;;  %v1658_v13 = vmul.f32 -1.442695, %v794_v63 }
 0xbb4   :  { %v1845_v4 = vpop.f32.mrf.mxu0 }
 0xbb6   :  { %v855_v6 = vpop.f32.mrf.mxu0 }
 0xbb7   :  { %v861_v7 = vadd.f32 %v855_v6, %v820_v5 }
 0xbb8   :  { %v1860_v8 = vpop.f32.mrf.mxu0 }
 0xbb9   :  { %2029 = vtanh.f32 %v861_v7  ;;  %v1660_v14 = vmul.f32 -1.442695, %v861_v7 }
 0xbba   :  { %v858_v9 = vpop.f32.mrf.mxu0  ;;  %2031 = vpow2.f32 %v1658_v13 }
 0xbbb   :  { %2033 = vpow2.f32 %v1660_v14 }
 0xbbc   :  { %v1861_v10 = vpop.f32.mrf.mxu0 }
 0xbc0   :  { %v2028_v11 = vpop.eup %2027 }
 0xbc1   :  { %804 = vrot.lane.b32.xlu1 %v2028_v11, %s2107_s30 }
 0xbc6   :  { %v2030_v12 = vpop.eup %2029 }
 0xbc7   :  { %871 = vrot.lane.b32.xlu0 %v2030_v12, %s2107_s30  ;;  %v2032_v15 = vpop.eup %2031 }
 0xbc8   :  { %v798_v16 = vadd.f32 1.0, %v2032_v15  ;;  %v2034_v17 = vpop.eup %2033 }
 0xbc9   :  { %v865_v18 = vadd.f32 1.0, %v2034_v17 }
 0xbca   :  { %2035 = vrcp.f32 %v798_v16 }
 0xbcb   :  { %2037 = vrcp.f32 %v865_v18 }
 0xbd7   :  { %v2036_v19 = vpop.eup %2035 }
 0xbd8   :  { %v2038_v26 = vpop.eup %2037  ;;  %v802_v29 = vmul.f32 %v2036_v19, %v2324_v42 }
 0xbd9   :  { %v869_v32 = vmul.f32 %v2038_v26, %v2328_v45 }
 0xc33   :  { %v805_v24 = vpop.permute.xlu1 %804 }
 0xc34   :  { %v807_v25 = vmul.f32 %v2036_v19, %v805_v24 }
 0xc36   :  { %809 = vrot.lane.b32.xlu1 %v807_v25, %s2108_s8 }
 0xc39   :  { %v872_v27 = vpop.permute.xlu0 %871 }
 0xc3a   :  { %v874_v28 = vmul.f32 %v2038_v26, %v872_v27 }
 0xc3c   :  { %876 = vrot.lane.b32.xlu0 %v874_v28, %s2108_s8 }
 0xca8   :  { %v810_v30 = vpop.permute.xlu1 %809 }
 0xca9   :  { %v2365_v31 = vadd.f32 %v810_v30, %v802_v29 }
 0xcab   :  { %2039 = vtanh.f32 %v2365_v31 }
 0xcae   :  { %v877_v34 = vpop.permute.xlu0 %876 }
 0xcaf   :  { %v2369_v35 = vadd.f32 %v877_v34, %v869_v32 }
 0xcb1   :  { %2041 = vtanh.f32 %v2369_v35 }
 0xcb8   :  { %v2040_v36 = vpop.eup %2039 }
 0xcb9   :  { %815 = vrot.lane.b32.xlu1 %v2040_v36, %s2107_s30 }
 0xcbe   :  { %v2042_v37 = vpop.eup %2041 }
 0xcbf   :  { %882 = vrot.lane.b32.xlu0 %v2042_v37, %s2107_s30 }
 0xd2b   :  { %v816_v38 = vpop.permute.xlu1 %815 }
 0xd2c   :  { %v818_v39 = vmul.f32 %v2036_v19, %v816_v38 }
 0xd2e   :  { %v819_v40 = vpack.c.bf16 %v818_v39, %v818_v39 }
 0xd30   :  { %934 = vrot.lane.b32.xlu1 %v819_v40, %s2108_s8 }
 0xd31   :  { %v883_v41 = vpop.permute.xlu0 %882 }
 0xd32   :  { %v885_v42 = vmul.f32 %v2038_v26, %v883_v41 }
 0xd34   :  { %v886_v43 = vpack.c.bf16 %v885_v42, %v885_v42 }
 0xd36   :  { %888 = vrot.lane.b32.xlu0 %v886_v43, %s2108_s8  ;;  %v1190_v43 = vld [vmem:[%s2526_s0 + $0x30] sm:$0xff] }
 0xda2   :  { %v935_v44 = vpop.permute.xlu1 %934 }
 0xda3   :  { %1875 = vmatmul.mubr.msk.bf16.vlgmr.msra.gmra.mxu0 %vm59_vm1, %v935_v44 }
 0xda4   :  { %1887 = vmatpush3.bf16.msra.mxu0 %v2182_v20  ;;  %1890 = vmatprep.mubr.msk.bf16.mxu0 %vm2105_vm0, %v2104_v0 }
 0xda5   :  { %1888 = vmatprep.subr.bf16.mxu0 %v2104_v0 }
 0xda8   :  { %v889_v45 = vpop.permute.xlu0 %888  ;;  %1889 = vmatpush3.bf16.msra.mxu0 %v2193_v22 }
 0xda9   :  { %1867 = vmatmul.mubr.msk.bf16.vlgmr.msra.gmra.mxu1 %vm59_vm1, %v889_v45  ;;  %1902 = vmatprep.subr.bf16.mxu0 %v2104_v0 }
 0xdaa   :  { %1879 = vmatpush3.bf16.msra.mxu1 %v2153_v1  ;;  %1882 = vmatprep.mubr.msk.bf16.mxu1 %vm2105_vm0, %v2104_v0 }
 0xdab   :  { %1880 = vmatprep.subr.bf16.mxu1 %v2104_v0 }
 0xdae   :  { %1881 = vmatpush3.bf16.msra.mxu1 %v2164_v2 }
 0xdaf   :  { %1894 = vmatprep.subr.bf16.mxu1 %v2104_v0 }
 0xdb1   :  { %1883 = vmatmul.mubr.msk.bf16.vlgmr.msra.gmra.mxu1 %vm59_vm1, %v889_v45 }
 0xdb2   :  { %1895 = vmatpush3.bf16.msra.mxu1 %v2187_v21  ;;  %1898 = vmatprep.mubr.msk.bf16.mxu1 %vm2105_vm0, %v2104_v0 }
 0xdb3   :  { %1896 = vmatprep.subr.bf16.mxu1 %v2104_v0 }
 0xdb6   :  { %1897 = vmatpush3.bf16.msra.mxu1 %v2200_v23 }
 0xdb7   :  { %1910 = vmatprep.subr.bf16.mxu1 %v2104_v0 }
 0xe63   :  { %v973_v46 = vpop.f32.mrf.mxu0 }
 0xe65   :  { %v1876_v47 = vpop.f32.mrf.mxu0 }
 0xe67   :  { %v976_v48 = vpop.f32.mrf.mxu0 }
 0xe69   :  { %v927_v49 = vpop.f32.mrf.mxu1  ;;  %v1877_v50 = vpop.f32.mrf.mxu0 }
 0xe6a   :  { %v928_v51 = vadd.f32 %v2232_v33, %v927_v49 }
 0xe6b   :  { %v1868_v52 = vpop.f32.mrf.mxu1 }
 0xe6c   :  { %v979_v53 = vadd.f32 %v973_v46, %v928_v51 }
 0xe6d   :  { %v930_v54 = vpop.f32.mrf.mxu1 }
 0xe6e   :  { %2043 = vtanh.f32 %v979_v53  ;;  %v1663_v3 = vmul.f32 -1.442695, %v979_v53 }
 0xe6f   :  { %v1869_v55 = vpop.f32.mrf.mxu1 }
 0xe71   :  { %v1040_v57 = vpop.f32.mrf.mxu1 }
 0xe72   :  { %v1046_v58 = vadd.f32 %v1040_v57, %v1005_v56 }
 0xe73   :  { %v1884_v59 = vpop.f32.mrf.mxu1 }
 0xe74   :  { %2045 = vtanh.f32 %v1046_v58  ;;  %v1665_v4 = vmul.f32 -1.442695, %v1046_v58 }
 0xe75   :  { %v1043_v60 = vpop.f32.mrf.mxu1  ;;  %2047 = vpow2.f32 %v1663_v3 }
 0xe76   :  { %2049 = vpow2.f32 %v1665_v4 }
 0xe77   :  { %v1885_v61 = vpop.f32.mrf.mxu1 }
 0xe7b   :  { %v2044_v62 = vpop.eup %2043 }
 0xe7c   :  { %989 = vrot.lane.b32.xlu1 %v2044_v62, %s2107_s30 }
 0xe81   :  { %v2046_v63 = vpop.eup %2045 }
 0xe82   :  { %1056 = vrot.lane.b32.xlu0 %v2046_v63, %s2107_s30  ;;  %v2048_v5 = vpop.eup %2047 }
 0xe83   :  { %v983_v6 = vadd.f32 1.0, %v2048_v5  ;;  %v2050_v7 = vpop.eup %2049 }
 0xe84   :  { %v1050_v8 = vadd.f32 1.0, %v2050_v7 }
 0xe85   :  { %2051 = vrcp.f32 %v983_v6 }
 0xe86   :  { %2053 = vrcp.f32 %v1050_v8 }
 0xe92   :  { %v2052_v9 = vpop.eup %2051 }
 0xe93   :  { %v2054_v12 = vpop.eup %2053  ;;  %v987_v15 = vmul.f32 %v2052_v9, %v2365_v31 }
 0xe94   :  { %v1054_v18 = vmul.f32 %v2054_v12, %v2369_v35 }
 0xeee   :  { %v990_v10 = vpop.permute.xlu1 %989 }
 0xeef   :  { %v992_v11 = vmul.f32 %v2052_v9, %v990_v10 }
 0xef1   :  { %994 = vrot.lane.b32.xlu1 %v992_v11, %s2108_s8 }
 0xef4   :  { %v1057_v13 = vpop.permute.xlu0 %1056 }
 0xef5   :  { %v1059_v14 = vmul.f32 %v2054_v12, %v1057_v13 }
 0xef7   :  { %1061 = vrot.lane.b32.xlu0 %v1059_v14, %s2108_s8 }
 0xf63   :  { %v995_v16 = vpop.permute.xlu1 %994 }
 0xf64   :  { %v2406_v17 = vadd.f32 %v995_v16, %v987_v15 }
 0xf66   :  { %2055 = vtanh.f32 %v2406_v17 }
 0xf69   :  { %v1062_v19 = vpop.permute.xlu0 %1061 }
 0xf6a   :  { %v2410_v24 = vadd.f32 %v1062_v19, %v1054_v18  ;;  %v2102_v18 = vld [vmem:[%s2528_s4] sm:$0xff]  }
 0xf6c   :  { %2057 = vtanh.f32 %v2410_v24 }
 0xf73   :  { %v2056_v25 = vpop.eup %2055 }
 0xf74   :  { %1000 = vrot.lane.b32.xlu1 %v2056_v25, %s2107_s30 }
 0xf79   :  { %v2058_v26 = vpop.eup %2057 }
 0xf7a   :  { %1067 = vrot.lane.b32.xlu0 %v2058_v26, %s2107_s30 }
 0xfe6   :  { %v1001_v27 = vpop.permute.xlu1 %1000 }
 0xfe7   :  { %v1003_v28 = vmul.f32 %v2052_v9, %v1001_v27 }
 0xfe9   :  { %v1004_v29 = vpack.c.bf16 %v1003_v28, %v1003_v28 }
 0xfeb   :  { %1119 = vrot.lane.b32.xlu1 %v1004_v29, %s2108_s8 }
 0xfec   :  { %v1068_v30 = vpop.permute.xlu0 %1067 }
 0xfed   :  { %v1070_v31 = vmul.f32 %v2054_v12, %v1068_v30 }
 0xfef   :  { %v1071_v32 = vpack.c.bf16 %v1070_v31, %v1070_v31 }
 0xff1   :  { %1073 = vrot.lane.b32.xlu0 %v1071_v32, %s2108_s8 }
0x105d   :  { %v1120_v34 = vpop.permute.xlu1 %1119 }
0x105e   :  { %1899 = vmatmul.mubr.msk.bf16.vlgmr.msra.gmra.mxu1 %vm59_vm1, %v1120_v34  ;;  %v1375_v34 = vld [vmem:[%s2526_s0 + $0x38] sm:$0xff] }
0x105f   :  { %1911 = vmatpush3.bf16.msra.mxu1 %v2182_v20  ;;  %1914 = vmatprep.mubr.msk.bf16.mxu1 %vm2105_vm0, %v2104_v0 }
0x1060   :  { %1912 = vmatprep.subr.bf16.mxu1 %v2104_v0 }
0x1063   :  { %v1074_v35 = vpop.permute.xlu0 %1073  ;;  %1913 = vmatpush3.bf16.msra.mxu1 %v2193_v22 }
0x1064   :  { %1891 = vmatmul.mubr.msk.bf16.vlgmr.msra.gmra.mxu0 %vm59_vm1, %v1074_v35  ;;  %1926 = vmatprep.subr.bf16.mxu1 %v2104_v0 }
0x1065   :  { %1903 = vmatpush3.bf16.msra.mxu0 %v2153_v1  ;;  %1906 = vmatprep.mubr.msk.bf16.mxu0 %vm2105_vm0, %v2104_v0 }
0x1066   :  { %1904 = vmatprep.subr.bf16.mxu0 %v2104_v0 }
0x1069   :  { %1905 = vmatpush3.bf16.msra.mxu0 %v2164_v2 }
0x106a   :  { %1918 = vmatprep.subr.bf16.mxu0 %v2104_v0 }
0x106c   :  { %1907 = vmatmul.mubr.msk.bf16.vlgmr.msra.gmra.mxu0 %vm59_vm1, %v1074_v35 }
0x106d   :  { %1919 = vmatpush3.bf16.msra.mxu0 %v2187_v21  ;;  %1922 = vmatprep.mubr.msk.bf16.mxu0 %vm2105_vm0, %v2104_v0 }
0x106e   :  { %1920 = vmatprep.subr.bf16.mxu0 %v2104_v0 }
0x1071   :  { %1921 = vmatpush3.bf16.msra.mxu0 %v2200_v23 }
0x1072   :  { %1934 = vmatprep.subr.bf16.mxu0 %v2104_v0 }
0x111e   :  { %v1158_v1 = vpop.f32.mrf.mxu1 }
0x1120   :  { %v1900_v36 = vpop.f32.mrf.mxu1 }
0x1122   :  { %v1161_v37 = vpop.f32.mrf.mxu1 }
0x1124   :  { %v1112_v38 = vpop.f32.mrf.mxu0  ;;  %v1901_v2 = vpop.f32.mrf.mxu1 }
0x1125   :  { %v1113_v39 = vadd.f32 %v2232_v33, %v1112_v38 }
0x1126   :  { %v1892_v40 = vpop.f32.mrf.mxu0 }
0x1127   :  { %v1164_v41 = vadd.f32 %v1158_v1, %v1113_v39 }
0x1128   :  { %v1115_v42 = vpop.f32.mrf.mxu0 }
0x1129   :  { %2059 = vtanh.f32 %v1164_v41  ;;  %v1668_v50 = vmul.f32 -1.442695, %v1164_v41 }
0x112a   :  { %v1893_v21 = vpop.f32.mrf.mxu0 }
0x112c   :  { %v1225_v44 = vpop.f32.mrf.mxu0 }
0x112d   :  { %v1231_v23 = vadd.f32 %v1225_v44, %v1190_v43 }
0x112e   :  { %v1908_v45 = vpop.f32.mrf.mxu0 }
0x112f   :  { %2061 = vtanh.f32 %v1231_v23  ;;  %v1670_v51 = vmul.f32 -1.442695, %v1231_v23 }
0x1130   :  { %v1228_v46 = vpop.f32.mrf.mxu0  ;;  %2063 = vpow2.f32 %v1668_v50 }
0x1131   :  { %2065 = vpow2.f32 %v1670_v51 }
0x1132   :  { %v1909_v47 = vpop.f32.mrf.mxu0 }
0x1136   :  { %v2060_v48 = vpop.eup %2059 }
0x1137   :  { %1174 = vrot.lane.b32.xlu1 %v2060_v48, %s2107_s30 }
0x113c   :  { %v2062_v49 = vpop.eup %2061 }
0x113d   :  { %1241 = vrot.lane.b32.xlu0 %v2062_v49, %s2107_s30  ;;  %v2064_v52 = vpop.eup %2063 }
0x113e   :  { %v1168_v53 = vadd.f32 1.0, %v2064_v52  ;;  %v2066_v54 = vpop.eup %2065 }
0x113f   :  { %v1235_v55 = vadd.f32 1.0, %v2066_v54 }
0x1140   :  { %2067 = vrcp.f32 %v1168_v53 }
0x1141   :  { %2069 = vrcp.f32 %v1235_v55 }
0x114d   :  { %v2068_v56 = vpop.eup %2067 }
0x114e   :  { %v2070_v59 = vpop.eup %2069  ;;  %v1172_v62 = vmul.f32 %v2068_v56, %v2406_v17  ;;  %v2099_v17 = vld [vmem:[%s2525_s1 + $0x8] sm:$0xff]  }
0x114f   :  { %v1239_v4 = vmul.f32 %v2070_v59, %v2410_v24 }
0x11a9   :  { %v1175_v57 = vpop.permute.xlu1 %1174 }
0x11aa   :  { %v1177_v58 = vmul.f32 %v2068_v56, %v1175_v57 }
0x11ac   :  { %1179 = vrot.lane.b32.xlu1 %v1177_v58, %s2108_s8 }
0x11af   :  { %v1242_v60 = vpop.permute.xlu0 %1241 }
0x11b0   :  { %v1244_v61 = vmul.f32 %v2070_v59, %v1242_v60 }
0x11b2   :  { %1246 = vrot.lane.b32.xlu0 %v1244_v61, %s2108_s8 }
0x121e   :  { %v1180_v63 = vpop.permute.xlu1 %1179 }
0x121f   :  { %v2447_v3 = vadd.f32 %v1180_v63, %v1172_v62 }
0x1221   :  { %2071 = vtanh.f32 %v2447_v3 }
0x1224   :  { %v1247_v5 = vpop.permute.xlu0 %1246 }
0x1225   :  { %v2451_v6 = vadd.f32 %v1247_v5, %v1239_v4 }
0x1227   :  { %2073 = vtanh.f32 %v2451_v6 }
0x122e   :  { %v2072_v7 = vpop.eup %2071 }
0x122f   :  { %1185 = vrot.lane.b32.xlu1 %v2072_v7, %s2107_s30 }
0x1234   :  { %v2074_v8 = vpop.eup %2073 }
0x1235   :  { %1252 = vrot.lane.b32.xlu0 %v2074_v8, %s2107_s30 }
0x12a1   :  { %v1186_v9 = vpop.permute.xlu1 %1185 }
0x12a2   :  { %v1188_v10 = vmul.f32 %v2068_v56, %v1186_v9  ;;  %v2103_v9 = vld [vmem:[%s2529_s3] ss:$0 sm:$0xff] }
0x12a4   :  { %v1189_v11 = vpack.c.bf16 %v1188_v10, %v1188_v10 }
0x12a6   :  { %1304 = vrot.lane.b32.xlu1 %v1189_v11, %s2108_s8 }
0x12a7   :  { %v1253_v12 = vpop.permute.xlu0 %1252 }
0x12a8   :  { %v1255_v13 = vmul.f32 %v2070_v59, %v1253_v12 }
0x12aa   :  { %v1256_v14 = vpack.c.bf16 %v1255_v13, %v1255_v13 }
0x12ac   :  { %1258 = vrot.lane.b32.xlu0 %v1256_v14, %s2108_s8 }
0x1318   :  { %v1305_v15 = vpop.permute.xlu1 %1304 }
0x1319   :  { %1923 = vmatmul.mubr.msk.bf16.vlgmr.msra.gmra.mxu0 %vm59_vm1, %v1305_v15 }
0x131a   :  { %1935 = vmatpush3.bf16.msra.mxu0 %v2182_v20  ;;  %1938 = vmatprep.mubr.msk.bf16.mxu0 %vm2105_vm0, %v2104_v0  ;;  %v2100_v20 = vld [vmem:[%s2525_s1] sm:$0xff]  }
0x131b   :  { %1936 = vmatprep.subr.bf16.mxu0 %v2104_v0 }
0x131e   :  { %v1259_v16 = vpop.permute.xlu0 %1258  ;;  %1937 = vmatpush3.bf16.msra.mxu0 %v2193_v22  ;;  %v2101_v22 = vld [vmem:[%s2528_s4 + $0x8] sm:$0xff]  }
0x131f   :  { %1915 = vmatmul.mubr.msk.bf16.vlgmr.msra.gmra.mxu1 %vm59_vm1, %v1259_v16  ;;  %1950 = vmatprep.subr.bf16.mxu0 %v2104_v0 }
0x1320   :  { %1927 = vmatpush3.bf16.msra.mxu1 %v2099_v17  ;;  %1930 = vmatprep.mubr.msk.bf16.mxu1 %vm2105_vm0, %v2104_v0 }
0x1321   :  { %1928 = vmatprep.subr.bf16.mxu1 %v2104_v0 }
0x1324   :  { %1929 = vmatpush3.bf16.msra.mxu1 %v2100_v20 }
0x1325   :  { %1942 = vmatprep.subr.bf16.mxu1 %v2104_v0 }
0x1327   :  { %1931 = vmatmul.mubr.msk.bf16.vlgmr.msra.gmra.mxu1 %vm59_vm1, %v1259_v16 }
0x1328   :  { %1943 = vmatpush3.bf16.msra.mxu1 %v2101_v22  ;;  %1946 = vmatprep.mubr.msk.bf16.mxu1 %vm2105_vm0, %v2104_v0 }
0x1329   :  { %1944 = vmatprep.subr.bf16.mxu1 %v2104_v0 }
0x132c   :  { %1945 = vmatpush3.bf16.msra.mxu1 %v2102_v18 }
0x13d9   :  { %v1343_v19 = vpop.f32.mrf.mxu0 }
0x13db   :  { %v1924_v24 = vpop.f32.mrf.mxu0 }
0x13dd   :  { %v1346_v25 = vpop.f32.mrf.mxu0 }
0x13df   :  { %v1297_v26 = vpop.f32.mrf.mxu1  ;;  %v1925_v27 = vpop.f32.mrf.mxu0 }
0x13e0   :  { %v1298_v28 = vadd.f32 %v2232_v33, %v1297_v26  ;;  %v1969_v27 = vld [vmem:[%s2530_s5 + $0x8] sm:$0xff]  }
0x13e1   :  { %v1916_v29 = vpop.f32.mrf.mxu1 }
0x13e2   :  { %v1349_v30 = vadd.f32 %v1343_v19, %v1298_v28  ;;  %v1970_v28 = vld [vmem:[%s2530_s5] sm:$0xff]  }
0x13e3   :  { %v1300_v31 = vpop.f32.mrf.mxu1 }
0x13e4   :  { %2075 = vtanh.f32 %v1349_v30  ;;  %v1673_v33 = vmul.f32 -1.442695, %v1349_v30 }
0x13e5   :  { %v1917_v32 = vpop.f32.mrf.mxu1 }
0x13e7   :  { %v1410_v35 = vpop.f32.mrf.mxu1 }
0x13e8   :  { %v1416_v1 = vadd.f32 %v1410_v35, %v1375_v34  ;;  %v1679_v35 = vld [vmem:[%s2531_s6] ss:$0 sm:$0xff] }
0x13e9   :  { %v1932_v36 = vpop.f32.mrf.mxu1 }
0x13ea   :  { %2077 = vtanh.f32 %v1416_v1  ;;  %v1675_v40 = vmul.f32 -1.442695, %v1416_v1 }
0x13eb   :  { %v1413_v37 = vpop.f32.mrf.mxu1  ;;  %2079 = vpow2.f32 %v1673_v33 }
0x13ec   :  { %2081 = vpow2.f32 %v1675_v40 }
0x13ed   :  { %v1933_v38 = vpop.f32.mrf.mxu1 }
0x13f1   :  { %v2076_v2 = vpop.eup %2075 }
0x13f2   :  { %1359 = vrot.lane.b32.xlu1 %v2076_v2, %s2107_s30 }
0x13f7   :  { %v2078_v39 = vpop.eup %2077 }
0x13f8   :  { %1426 = vrot.lane.b32.xlu0 %v2078_v39, %s2107_s30  ;;  %v2080_v41 = vpop.eup %2079 }
0x13f9   :  { %v1353_v42 = vadd.f32 1.0, %v2080_v41  ;;  %v2082_v21 = vpop.eup %2081 }
0x13fa   :  { %v1420_v43 = vadd.f32 1.0, %v2082_v21 }
0x13fb   :  { %2083 = vrcp.f32 %v1353_v42 }
0x13fc   :  { %2085 = vrcp.f32 %v1420_v43 }
0x1408   :  { %v2084_v44 = vpop.eup %2083 }
0x1409   :  { %v2086_v46 = vpop.eup %2085  ;;  %v1357_v49 = vmul.f32 %v2084_v44, %v2447_v3 }
0x140a   :  { %v1424_v52 = vmul.f32 %v2086_v46, %v2451_v6 }
0x1464   :  { %v1360_v23 = vpop.permute.xlu1 %1359 }
0x1465   :  { %v1362_v45 = vmul.f32 %v2084_v44, %v1360_v23 }
0x1467   :  { %1364 = vrot.lane.b32.xlu1 %v1362_v45, %s2108_s8 }
0x146a   :  { %v1427_v47 = vpop.permute.xlu0 %1426 }
0x146b   :  { %v1429_v48 = vmul.f32 %v2086_v46, %v1427_v47 }
0x146d   :  { %1431 = vrot.lane.b32.xlu0 %v1429_v48, %s2108_s8 }
0x14d9   :  { %v1365_v50 = vpop.permute.xlu1 %1364 }
0x14da   :  { %v1367_v51 = vadd.f32 %v1365_v50, %v1357_v49 }
0x14dc   :  { %2087 = vtanh.f32 %v1367_v51 }
0x14df   :  { %v1432_v53 = vpop.permute.xlu0 %1431 }
0x14e0   :  { %v1434_v54 = vadd.f32 %v1432_v53, %v1424_v52 }
0x14e2   :  { %2089 = vtanh.f32 %v1434_v54 }
0x14e9   :  { %v2088_v55 = vpop.eup %2087 }
0x14ea   :  { %1370 = vrot.lane.b32.xlu1 %v2088_v55, %s2107_s30 }
0x14ef   :  { %v2090_v56 = vpop.eup %2089 }
0x14f0   :  { %1437 = vrot.lane.b32.xlu0 %v2090_v56, %s2107_s30 }
0x155c   :  { %v1371_v57 = vpop.permute.xlu1 %1370 }
0x155d   :  { %v1373_v58 = vmul.f32 %v2084_v44, %v1371_v57 }
0x155f   :  { %v1374_v59 = vpack.c.bf16 %v1373_v58, %v1373_v58 }
0x1561   :  { %1489 = vrot.lane.b32.xlu1 %v1374_v59, %s2108_s8 }
0x1562   :  { %v1438_v60 = vpop.permute.xlu0 %1437 }
0x1563   :  { %v1440_v61 = vmul.f32 %v2086_v46, %v1438_v60 }
0x1565   :  { %v1441_v62 = vpack.c.bf16 %v1440_v61, %v1440_v61 }
0x1567   :  { %1443 = vrot.lane.b32.xlu0 %v1441_v62, %s2108_s8 }
0x15d3   :  { %v1490_v63 = vpop.permute.xlu1 %1489 }
0x15d4   :  { %1947 = vmatmul.mubr.msk.bf16.vlgmr.msra.gmra.mxu1 %vm59_vm1, %v1490_v63 }
0x15d9   :  { %v1444_v3 = vpop.permute.xlu0 %1443 }
0x15da   :  { %1939 = vmatmul.mubr.msk.bf16.vlgmr.msra.gmra.mxu0 %vm59_vm1, %v1444_v3 }
0x15db   :  { %1954 = vmatprep.mubr.msk.bf16.mxu0 %vm2105_vm0, %v2104_v0  ;;  %1951 = vmatpush3.bf16.msra.mxu0 %v1969_v27 }
0x15dc   :  { %1952 = vmatprep.subr.bf16.mxu0 %v2104_v0 }
0x15df   :  { %1953 = vmatpush3.bf16.msra.mxu0 %v1970_v28 }
0x1694   :  { %v1528_v4 = vpop.f32.mrf.mxu1 }
0x1696   :  { %v1948_v5 = vpop.f32.mrf.mxu1 }
0x1698   :  { %v1531_v6 = vpop.f32.mrf.mxu1 }
0x169a   :  { %v1482_v7 = vpop.f32.mrf.mxu0  ;;  %v1949_v8 = vpop.f32.mrf.mxu1 }
0x169b   :  { %v1483_v10 = vadd.f32 %v2103_v9, %v1482_v7 }
0x169c   :  { %v1940_v11 = vpop.f32.mrf.mxu0 }
0x169d   :  { %v1534_v12 = vadd.f32 %v1528_v4, %v1483_v10 }
0x169e   :  { %v1485_v13 = vpop.f32.mrf.mxu0 }
0x169f   :  { %2091 = vtanh.f32 %v1534_v12  ;;  %v1678_v16 = vmul.f32 -1.442695, %v1534_v12 }
0x16a0   :  { %v1941_v14 = vpop.f32.mrf.mxu0 }
0x16a1   :  { %2093 = vpow2.f32 %v1678_v16 }
0x16ac   :  { %v2092_v15 = vpop.eup %2091 }
0x16ad   :  { %1544 = vrot.lane.b32.xlu0 %v2092_v15, %s2107_s30 }
0x16ae   :  { %v2094_v17 = vpop.eup %2093 }
0x16af   :  { %v1538_v20 = vadd.f32 1.0, %v2094_v17 }
0x16b1   :  { %2095 = vrcp.f32 %v1538_v20 }
0x16be   :  { %v2096_v22 = vpop.eup %2095 }
0x16bf   :  { %v1542_v24 = vmul.f32 %v2096_v22, %v1367_v51 }
0x171f   :  { %v1545_v18 = vpop.permute.xlu0 %1544 }
0x1720   :  { %v1547_v19 = vmul.f32 %v2096_v22, %v1545_v18 }
0x1722   :  { %1549 = vrot.lane.b32.xlu1 %v1547_v19, %s2108_s8 }
0x1794   :  { %v1550_v25 = vpop.permute.xlu1 %1549 }
0x1795   :  { %v1552_v26 = vadd.f32 %v1550_v25, %v1542_v24 }
0x1797   :  { %2097 = vtanh.f32 %v1552_v26 }
0x17a4   :  { %v2098_v29 = vpop.eup %2097 }
0x17a5   :  { %1555 = vrot.lane.b32.xlu0 %v2098_v29, %s2107_s30 }
0x1817   :  { %v1556_v30 = vpop.permute.xlu0 %1555 }
0x1818   :  { %v1558_v31 = vmul.f32 %v2096_v22, %v1556_v30 }
0x181a   :  { %v1559_v32 = vpack.c.bf16 %v1558_v31, %v1558_v31 }
0x181c   :  { %1572 = vrot.lane.b32.xlu1 %v1559_v32, %s2108_s8 }
0x188e   :  { %v1573_v34 = vpop.permute.xlu1 %1572 }
0x188f   :  { %1955 = vmatmul.mubr.msk.bf16.vlgmr.msra.gmra.mxu0 %vm59_vm1, %v1573_v34 }
0x194f   :  { %v1623_v1 = vpop.f32.mrf.mxu0 }
0x1950   :  { %v1624_v36 = vadd.f32 %v1679_v35, %v1623_v1 }
0x1951   :  { %v1956_v37 = vpop.f32.mrf.mxu0 }
0x1952   :  { %1629 = vst [vmem:[%s2532_s7] sm:$0xff] %v1624_v36 }
0x1953   :  { %v1626_v0 = vpop.f32.mrf.mxu0 }
0x1955   :  { %v1957_v38 = vpop.f32.mrf.mxu0 }

</bundles_post_ra>
